<compile_context>
chip_gen: v6e
topology: v6e:2x2x1
jax: 0.10.0
libtpu: 0.0.40
codegen_flags: <defaults>
</compile_context>

<pallas_src>
import functools

import jax
import jax.numpy as jnp
import numpy as np
from jax import lax
from jax.experimental import pallas as pl
from jax.experimental.pallas import tpu as pltpu

LATENT = 32
HIDDEN = 64
N_NODES = 16
N_EDGES = 32
EPS = 1e-5                      # torch.nn.LayerNorm default
HI = lax.Precision.HIGHEST      # only for the one-hot gather/scatter matmuls


# ---------------------------------------------------------------- shared math
def _layernorm(x, gamma, beta):
    mu = jnp.mean(x, axis=-1, keepdims=True)
    var = jnp.mean((x - mu) ** 2, axis=-1, keepdims=True)
    return (x - mu) * lax.rsqrt(var + EPS) * gamma + beta


# ---------------------------------------------------------------- fused kernel
def gnn_cell_kernel(recv_row_ref, idx_col_ref, nodes_ref, edges_ref,
                    nw1_ref, nw2_ref, nsmall_ref,
                    ew1_ref, ew2_ref, esmall_ref,
                    nodes_out_ref, edges_out_ref, *, num_iters):
    nodes0 = nodes_ref[...]            # (N, L)
    edges0 = edges_ref[...]            # (E, L)
    n, l = nodes0.shape
    e = edges0.shape[0]

    # ---- one-hot masks: built ONCE, reused across fused iterations --------
    # Scatter mask (N, E): column j is one_hot(recv[j], N).  Built from a
    # (1, E) index row -> only a sublane-broadcast compare.
    recv_row = recv_row_ref[...]                       # (1, E) int32 = graph[1]
    recv_mask = (lax.broadcasted_iota(jnp.int32, (n, e), 0)
                 == recv_row).astype(jnp.float32)      # (N, E)

    # Gather mask in natural (2E, N) orientation so the gather is a plain
    # (2E,N)@(N,L) matmul (no dim-0 contraction / implicit transpose).
    idx_col = idx_col_ref[...]                         # (2E, 1) int32 = [src ; recv]
    gather_mask = (lax.broadcasted_iota(jnp.int32, (2 * e, n), 1)
                   == idx_col).astype(jnp.float32)     # (2E, N)

    # ---- weights / packed small vectors loaded once ------------------------
    nw1 = nw1_ref[...]; nw2 = nw2_ref[...]
    ew1 = ew1_ref[...]; ew2 = ew2_ref[...]
    nb1, ng1, nbe1 = nsmall_ref[0:1, :], nsmall_ref[1:2, :], nsmall_ref[2:3, :]
    nb2, ng2, nbe2 = nsmall_ref[3:4, :l], nsmall_ref[4:5, :l], nsmall_ref[5:6, :l]
    eb1, eg1, ebe1 = esmall_ref[0:1, :], esmall_ref[1:2, :], esmall_ref[2:3, :]
    eb2, eg2, ebe2 = esmall_ref[3:4, :l], esmall_ref[4:5, :l], esmall_ref[5:6, :l]

    def one_iteration(nodes, edges):
        # ---------------- node update ----------------
        # scatter_add(edges, recv, dim=0, dim_size=N) == one_hot(recv,N) @ edges.
        # HIGHEST only here: keeps the one-hot select/sum exact for f32.
        edge_msg = jnp.dot(recv_mask, edges,
                           preferred_element_type=jnp.float32,
                           precision=HI)                       # (N, L)

        # First Linear as ONE K=2L contraction (lane concat -> XLU, idle here).
        node_in = jnp.concatenate([nodes, edge_msg], axis=-1)  # (N, 2L)
        h = jnp.dot(node_in, nw1, preferred_element_type=jnp.float32) + nb1
        h = _layernorm(h, ng1, nbe1)
        h = jnp.maximum(h, 0.0)                                # hidden ReLU
        y = jnp.dot(h, nw2, preferred_element_type=jnp.float32) + nb2
        y = _layernorm(y, ng2, nbe2)
        new_nodes = jnp.maximum(y, 0.0) + nodes                # output ReLU + residual

        # ---------------- edge update ----------------
        # Both gathers new_nodes[src] / new_nodes[recv] in one plain matmul.
        gathered = jnp.dot(gather_mask, new_nodes,
                           preferred_element_type=jnp.float32,
                           precision=HI)                       # (2E, L)
        # First Linear as ONE K=3L contraction: [src | recv | edges].
        edge_in = jnp.concatenate(
            [gathered[0:e, :], gathered[e:2 * e, :], edges], axis=-1)  # (E, 3L)
        h = jnp.dot(edge_in, ew1, preferred_element_type=jnp.float32) + eb1
        h = _layernorm(h, eg1, ebe1)
        h = jnp.maximum(h, 0.0)
        y = jnp.dot(h, ew2, preferred_element_type=jnp.float32) + eb2
        y = _layernorm(y, eg2, ebe2)
        new_edges = jnp.tanh(y) + edges                        # Tanh + residual
        return new_nodes, new_edges

    # Fuse num_iters message-passing iterations in one kernel launch
    # (statically unrolled; num_iters is a trace-time constant).
    nodes_c, edges_c = nodes0, edges0
    for _ in range(num_iters):
        nodes_c, edges_c = one_iteration(nodes_c, edges_c)

    nodes_out_ref[...] = nodes_c
    edges_out_ref[...] = edges_c


# ---------------------------------------------------------------- wrapper
def interaction_gnn_cell(nodes, edges, graph, node_params, edge_params,
                         num_iters=1):
    n, latent = nodes.shape
    e = edges.shape[0]
    graph = graph.astype(jnp.int32)
    recv_row = graph[1].reshape(1, e)                                 # (1, E)
    idx_col = jnp.concatenate([graph[0], graph[1]]).reshape(2 * e, 1)  # (2E, 1) [src; recv]

    args = (recv_row, idx_col, nodes, edges) + tuple(node_params) + tuple(edge_params)
    vmem = pl.BlockSpec(memory_space=pltpu.MemorySpace.VMEM)
    new_nodes, new_edges = pl.pallas_call(
        functools.partial(gnn_cell_kernel, num_iters=num_iters),
        out_shape=(jax.ShapeDtypeStruct((n, latent), jnp.float32),
                   jax.ShapeDtypeStruct((e, latent), jnp.float32)),
        in_specs=[vmem] * len(args),
        out_specs=(vmem, vmem),
        # new_nodes reuses the nodes buffer, new_edges reuses the edges buffer.
        input_output_aliases={2: 0, 3: 1},
    )(*args)
    return new_nodes, new_edges


# ---------------------------------------------------------------- params
def _linear_init(key, fan_in, fan_out):
    # torch.nn.Linear default init: U(-1/sqrt(fan_in), 1/sqrt(fan_in))
    kw, kb = jax.random.split(key)
    bound = 1.0 / np.sqrt(fan_in)
    w = jax.random.uniform(kw, (fan_in, fan_out), jnp.float32, -bound, bound)
    b = jax.random.uniform(kb, (fan_out,), jnp.float32, -bound, bound)
    return w, b


def make_mlp_params(key, in_dim, hidden, out_dim):
    """Returns (w1, w2, slab) with the 6 small vectors packed into one slab.

    slab rows: 0=b1, 1=g1, 2=be1, 3=b2, 4=g2, 5=be2  (rows 3-5 padded to `hidden`).
    """
    k1, k2 = jax.random.split(key)
    w1, b1 = _linear_init(k1, in_dim, hidden)
    w2, b2 = _linear_init(k2, hidden, out_dim)
    pad = lambda v: jnp.pad(v, (0, hidden - v.shape[0]))
    slab = jnp.stack([
        b1,
        jnp.ones((hidden,), jnp.float32),         # g1
        jnp.zeros((hidden,), jnp.float32),        # be1
        pad(b2),
        pad(jnp.ones((out_dim,), jnp.float32)),   # g2
        pad(jnp.zeros((out_dim,), jnp.float32)),  # be2
    ], axis=0)                                    # (6, hidden)
    return (w1, w2, slab)


# ---------------------------------------------------------------- pure-JAX reference
def _ref_mlp(x, w1, w2, slab, out_dim, out_act):
    b1, g1, be1 = slab[0], slab[1], slab[2]
    b2, g2, be2 = slab[3, :out_dim], slab[4, :out_dim], slab[5, :out_dim]
    h = _layernorm(x @ w1 + b1, g1, be1)
    h = jnp.maximum(h, 0.0)
    y = _layernorm(h @ w2 + b2, g2, be2)
    return out_act(y)


def reference(nodes, edges, graph, node_params, edge_params):
    latent = nodes.shape[1]
    recv = graph[1]
    msgs = jax.ops.segment_sum(edges, recv, num_segments=nodes.shape[0])
    new_nodes = _ref_mlp(jnp.concatenate([nodes, msgs], -1), *node_params,
                         out_dim=latent, out_act=lambda t: jnp.maximum(t, 0.0)) + nodes
    ein = jnp.concatenate([new_nodes[graph[0]], new_nodes[graph[1]], edges], -1)
    new_edges = _ref_mlp(ein, *edge_params, out_dim=latent, out_act=jnp.tanh) + edges
    return new_nodes, new_edges


def reference_iters(nodes, edges, graph, node_params, edge_params, num_iters):
    for _ in range(num_iters):
        nodes, edges = reference(nodes, edges, graph, node_params, edge_params)
    return nodes, edges


# ---------------------------------------------------------------- main
if __name__ == "__main__":
    key = jax.random.PRNGKey(0)
    k_nodes, k_edges, k_graph, k_np, k_ep = jax.random.split(key, 5)

    nodes = jax.random.normal(k_nodes, (N_NODES, LATENT), jnp.float32)
    edges = jax.random.normal(k_edges, (N_EDGES, LATENT), jnp.float32)
    graph = jax.random.randint(k_graph, (2, N_EDGES), 0, N_NODES, jnp.int32)

    node_params = make_mlp_params(k_np, 2 * LATENT, HIDDEN, LATENT)   # node_network
    edge_params = make_mlp_params(k_ep, 3 * LATENT, HIDDEN, LATENT)   # edge_network

    FUSED_ITERS = 4

    # References first (the fused kernel donates + writes its inputs in place).
    ref1_n, ref1_e = reference(nodes, edges, graph, node_params, edge_params)
    refK_n, refK_e = reference_iters(nodes, edges, graph, node_params,
                                     edge_params, FUSED_ITERS)
    jax.block_until_ready((ref1_n, ref1_e, refK_n, refK_e))

    fused = jax.jit(interaction_gnn_cell, static_argnames=("num_iters",),
                    donate_argnums=(0, 1))

    # Single iteration == the module's forward pass.
    out1_n, out1_e = fused(jnp.copy(nodes), jnp.copy(edges), graph,
                           node_params, edge_params, num_iters=1)
    # Multiple fused iterations (outer n_graph_iters loop) in one launch.
    outK_n, outK_e = fused(jnp.copy(nodes), jnp.copy(edges), graph,
                           node_params, edge_params, num_iters=FUSED_ITERS)
    jax.block_until_ready((out1_n, out1_e, outK_n, outK_e))

    # MLP matmuls now run at DEFAULT MXU precision (bf16 passes) per the perf
    # review; tolerance reflects that (gather/scatter stays exact via HIGHEST).
    TOL = 2e-2
    np.testing.assert_allclose(np.asarray(out1_n), np.asarray(ref1_n), rtol=TOL, atol=TOL)
    np.testing.assert_allclose(np.asarray(out1_e), np.asarray(ref1_e), rtol=TOL, atol=TOL)
    np.testing.assert_allclose(np.asarray(outK_n), np.asarray(refK_n), rtol=TOL, atol=TOL)
    np.testing.assert_allclose(np.asarray(outK_e), np.asarray(refK_e), rtol=TOL, atol=TOL)

    print("KERNEL_OK")
</pallas_src>

<mosaic_0001>
module attributes {stable_mosaic.version = 11 : i64} {
  func.func @gnn_cell_kernel(%arg0: memref<1x32xi32, #tpu.memory_space<vmem>>, %arg1: memref<64x1xi32, #tpu.memory_space<vmem>>, %arg2: memref<16x32xf32, #tpu.memory_space<vmem>>, %arg3: memref<32x32xf32, #tpu.memory_space<vmem>>, %arg4: memref<64x64xf32, #tpu.memory_space<vmem>>, %arg5: memref<64x32xf32, #tpu.memory_space<vmem>>, %arg6: memref<6x64xf32, #tpu.memory_space<vmem>>, %arg7: memref<96x64xf32, #tpu.memory_space<vmem>>, %arg8: memref<64x32xf32, #tpu.memory_space<vmem>>, %arg9: memref<6x64xf32, #tpu.memory_space<vmem>>, %arg10: memref<16x32xf32, #tpu.memory_space<vmem>>, %arg11: memref<32x32xf32, #tpu.memory_space<vmem>>) attributes {dimension_semantics = [], scalar_prefetch = 0 : i64, scratch_operands = 0 : i64, tpu.core_type = #tpu.core_type<tc>} {
    %c0 = arith.constant 0 : index
    %c0_0 = arith.constant 0 : index
    %0 = vector.load %arg2[%c0, %c0_0] : memref<16x32xf32, #tpu.memory_space<vmem>>, vector<16x32xf32>
    %c0_1 = arith.constant 0 : index
    %c0_2 = arith.constant 0 : index
    %1 = vector.load %arg3[%c0_1, %c0_2] : memref<32x32xf32, #tpu.memory_space<vmem>>, vector<32x32xf32>
    %c0_3 = arith.constant 0 : index
    %c0_4 = arith.constant 0 : index
    %2 = vector.load %arg0[%c0_3, %c0_4] : memref<1x32xi32, #tpu.memory_space<vmem>>, vector<1x32xi32>
    %3 = tpu.iota {dimensions = array<i32: 0>} : vector<16x32xi32>
    %4 = vector.broadcast %2 : vector<1x32xi32> to vector<16x32xi32>
    %5 = arith.cmpi eq, %3, %4 : vector<16x32xi32>
    %6 = arith.extui %5 : vector<16x32xi1> to vector<16x32xi32>
    %7 = arith.sitofp %6 : vector<16x32xi32> to vector<16x32xf32>
    %c0_5 = arith.constant 0 : index
    %c0_6 = arith.constant 0 : index
    %8 = vector.load %arg1[%c0_5, %c0_6] : memref<64x1xi32, #tpu.memory_space<vmem>>, vector<64x1xi32>
    %9 = tpu.iota {dimensions = array<i32: 1>} : vector<64x16xi32>
    %10 = vector.broadcast %8 : vector<64x1xi32> to vector<64x16xi32>
    %11 = arith.cmpi eq, %9, %10 : vector<64x16xi32>
    %12 = arith.extui %11 : vector<64x16xi1> to vector<64x16xi32>
    %13 = arith.sitofp %12 : vector<64x16xi32> to vector<64x16xf32>
    %c0_7 = arith.constant 0 : index
    %c0_8 = arith.constant 0 : index
    %14 = vector.load %arg4[%c0_7, %c0_8] : memref<64x64xf32, #tpu.memory_space<vmem>>, vector<64x64xf32>
    %c0_9 = arith.constant 0 : index
    %c0_10 = arith.constant 0 : index
    %15 = vector.load %arg5[%c0_9, %c0_10] : memref<64x32xf32, #tpu.memory_space<vmem>>, vector<64x32xf32>
    %c0_11 = arith.constant 0 : index
    %c0_12 = arith.constant 0 : index
    %16 = vector.load %arg7[%c0_11, %c0_12] : memref<96x64xf32, #tpu.memory_space<vmem>>, vector<96x64xf32>
    %c0_13 = arith.constant 0 : index
    %c0_14 = arith.constant 0 : index
    %17 = vector.load %arg8[%c0_13, %c0_14] : memref<64x32xf32, #tpu.memory_space<vmem>>, vector<64x32xf32>
    %c0_15 = arith.constant 0 : index
    %c0_16 = arith.constant 0 : index
    %18 = vector.load %arg6[%c0_15, %c0_16] : memref<6x64xf32, #tpu.memory_space<vmem>>, vector<1x64xf32>
    %c1 = arith.constant 1 : index
    %c0_17 = arith.constant 0 : index
    %19 = vector.load %arg6[%c1, %c0_17] : memref<6x64xf32, #tpu.memory_space<vmem>>, vector<1x64xf32>
    %c2 = arith.constant 2 : index
    %c0_18 = arith.constant 0 : index
    %20 = vector.load %arg6[%c2, %c0_18] : memref<6x64xf32, #tpu.memory_space<vmem>>, vector<1x64xf32>
    %c3 = arith.constant 3 : index
    %c0_19 = arith.constant 0 : index
    %21 = vector.load %arg6[%c3, %c0_19] : memref<6x64xf32, #tpu.memory_space<vmem>>, vector<1x32xf32>
    %c4 = arith.constant 4 : index
    %c0_20 = arith.constant 0 : index
    %22 = vector.load %arg6[%c4, %c0_20] : memref<6x64xf32, #tpu.memory_space<vmem>>, vector<1x32xf32>
    %c5 = arith.constant 5 : index
    %c0_21 = arith.constant 0 : index
    %23 = vector.load %arg6[%c5, %c0_21] : memref<6x64xf32, #tpu.memory_space<vmem>>, vector<1x32xf32>
    %c0_22 = arith.constant 0 : index
    %c0_23 = arith.constant 0 : index
    %24 = vector.load %arg9[%c0_22, %c0_23] : memref<6x64xf32, #tpu.memory_space<vmem>>, vector<1x64xf32>
    %c1_24 = arith.constant 1 : index
    %c0_25 = arith.constant 0 : index
    %25 = vector.load %arg9[%c1_24, %c0_25] : memref<6x64xf32, #tpu.memory_space<vmem>>, vector<1x64xf32>
    %c2_26 = arith.constant 2 : index
    %c0_27 = arith.constant 0 : index
    %26 = vector.load %arg9[%c2_26, %c0_27] : memref<6x64xf32, #tpu.memory_space<vmem>>, vector<1x64xf32>
    %c3_28 = arith.constant 3 : index
    %c0_29 = arith.constant 0 : index
    %27 = vector.load %arg9[%c3_28, %c0_29] : memref<6x64xf32, #tpu.memory_space<vmem>>, vector<1x32xf32>
    %c4_30 = arith.constant 4 : index
    %c0_31 = arith.constant 0 : index
    %28 = vector.load %arg9[%c4_30, %c0_31] : memref<6x64xf32, #tpu.memory_space<vmem>>, vector<1x32xf32>
    %c5_32 = arith.constant 5 : index
    %c0_33 = arith.constant 0 : index
    %29 = vector.load %arg9[%c5_32, %c0_33] : memref<6x64xf32, #tpu.memory_space<vmem>>, vector<1x32xf32>
    %cst = arith.constant dense<0.000000e+00> : vector<16x32xf32>
    %30 = tpu.matmul %7, %1, %cst {dimension_numbers = #tpu.dot_dimension_numbers<[1], [0], [0], [1], [0, 0, 1, 1], [], []>, precision = #tpu.contract_precision<fp32>} : vector<16x32xf32>, vector<32x32xf32>, vector<16x32xf32> -> vector<16x32xf32>
    %31 = tpu.concatenate %0, %30 in 1 : vector<16x32xf32>, vector<16x32xf32> -> vector<16x64xf32>
    %cst_34 = arith.constant dense<0.000000e+00> : vector<16x64xf32>
    %32 = tpu.matmul %31, %14, %cst_34 {dimension_numbers = #tpu.dot_dimension_numbers<[1], [0], [0], [1], [0, 0, 1, 1], [], []>} : vector<16x64xf32>, vector<64x64xf32>, vector<16x64xf32> -> vector<16x64xf32>
    %33 = vector.broadcast %18 : vector<1x64xf32> to vector<16x64xf32>
    %34 = arith.addf %32, %33 : vector<16x64xf32>
    %cst_35 = arith.constant dense<0.000000e+00> : vector<16xf32>
    %35 = vector.multi_reduction <add>, %34, %cst_35 [1] : vector<16x64xf32> to vector<16xf32>
    %36 = vector.shape_cast %35 : vector<16xf32> to vector<16x1xf32>
    %cst_36 = arith.constant 6.400000e+01 : f32
    %37 = vector.broadcast %cst_36 : f32 to vector<16x1xf32>
    %38 = arith.divf %36, %37 : vector<16x1xf32>
    %39 = vector.broadcast %38 : vector<16x1xf32> to vector<16x64xf32>
    %40 = arith.subf %34, %39 : vector<16x64xf32>
    %41 = arith.mulf %40, %40 : vector<16x64xf32>
    %cst_37 = arith.constant dense<0.000000e+00> : vector<16xf32>
    %42 = vector.multi_reduction <add>, %41, %cst_37 [1] : vector<16x64xf32> to vector<16xf32>
    %43 = vector.shape_cast %42 : vector<16xf32> to vector<16x1xf32>
    %cst_38 = arith.constant 6.400000e+01 : f32
    %44 = vector.broadcast %cst_38 : f32 to vector<16x1xf32>
    %45 = arith.divf %43, %44 : vector<16x1xf32>
    %46 = vector.broadcast %38 : vector<16x1xf32> to vector<16x64xf32>
    %47 = arith.subf %34, %46 : vector<16x64xf32>
    %cst_39 = arith.constant 9.99999974E-6 : f32
    %48 = vector.broadcast %cst_39 : f32 to vector<16x1xf32>
    %49 = arith.addf %45, %48 : vector<16x1xf32>
    %50 = math.rsqrt %49 : vector<16x1xf32>
    %51 = vector.broadcast %50 : vector<16x1xf32> to vector<16x64xf32>
    %52 = arith.mulf %47, %51 : vector<16x64xf32>
    %53 = vector.broadcast %19 : vector<1x64xf32> to vector<16x64xf32>
    %54 = arith.mulf %52, %53 : vector<16x64xf32>
    %55 = vector.broadcast %20 : vector<1x64xf32> to vector<16x64xf32>
    %56 = arith.addf %54, %55 : vector<16x64xf32>
    %cst_40 = arith.constant 0.000000e+00 : f32
    %57 = vector.broadcast %cst_40 : f32 to vector<16x64xf32>
    %58 = arith.maximumf %56, %57 : vector<16x64xf32>
    %cst_41 = arith.constant dense<0.000000e+00> : vector<16x32xf32>
    %59 = tpu.matmul %58, %15, %cst_41 {dimension_numbers = #tpu.dot_dimension_numbers<[1], [0], [0], [1], [0, 0, 1, 1], [], []>} : vector<16x64xf32>, vector<64x32xf32>, vector<16x32xf32> -> vector<16x32xf32>
    %60 = vector.broadcast %21 : vector<1x32xf32> to vector<16x32xf32>
    %61 = arith.addf %59, %60 : vector<16x32xf32>
    %cst_42 = arith.constant dense<0.000000e+00> : vector<16xf32>
    %62 = vector.multi_reduction <add>, %61, %cst_42 [1] : vector<16x32xf32> to vector<16xf32>
    %63 = vector.shape_cast %62 : vector<16xf32> to vector<16x1xf32>
    %cst_43 = arith.constant 3.200000e+01 : f32
    %64 = vector.broadcast %cst_43 : f32 to vector<16x1xf32>
    %65 = arith.divf %63, %64 : vector<16x1xf32>
    %66 = vector.broadcast %65 : vector<16x1xf32> to vector<16x32xf32>
    %67 = arith.subf %61, %66 : vector<16x32xf32>
    %68 = arith.mulf %67, %67 : vector<16x32xf32>
    %cst_44 = arith.constant dense<0.000000e+00> : vector<16xf32>
    %69 = vector.multi_reduction <add>, %68, %cst_44 [1] : vector<16x32xf32> to vector<16xf32>
    %70 = vector.shape_cast %69 : vector<16xf32> to vector<16x1xf32>
    %cst_45 = arith.constant 3.200000e+01 : f32
    %71 = vector.broadcast %cst_45 : f32 to vector<16x1xf32>
    %72 = arith.divf %70, %71 : vector<16x1xf32>
    %73 = vector.broadcast %65 : vector<16x1xf32> to vector<16x32xf32>
    %74 = arith.subf %61, %73 : vector<16x32xf32>
    %cst_46 = arith.constant 9.99999974E-6 : f32
    %75 = vector.broadcast %cst_46 : f32 to vector<16x1xf32>
    %76 = arith.addf %72, %75 : vector<16x1xf32>
    %77 = math.rsqrt %76 : vector<16x1xf32>
    %78 = vector.broadcast %77 : vector<16x1xf32> to vector<16x32xf32>
    %79 = arith.mulf %74, %78 : vector<16x32xf32>
    %80 = vector.broadcast %22 : vector<1x32xf32> to vector<16x32xf32>
    %81 = arith.mulf %79, %80 : vector<16x32xf32>
    %82 = vector.broadcast %23 : vector<1x32xf32> to vector<16x32xf32>
    %83 = arith.addf %81, %82 : vector<16x32xf32>
    %cst_47 = arith.constant 0.000000e+00 : f32
    %84 = vector.broadcast %cst_47 : f32 to vector<16x32xf32>
    %85 = arith.maximumf %83, %84 : vector<16x32xf32>
    %86 = arith.addf %85, %0 : vector<16x32xf32>
    %cst_48 = arith.constant dense<0.000000e+00> : vector<64x32xf32>
    %87 = tpu.matmul %13, %86, %cst_48 {dimension_numbers = #tpu.dot_dimension_numbers<[1], [0], [0], [1], [0, 0, 1, 1], [], []>, precision = #tpu.contract_precision<fp32>} : vector<64x16xf32>, vector<16x32xf32>, vector<64x32xf32> -> vector<64x32xf32>
    %88 = vector.extract_strided_slice %87 {offsets = [0, 0], sizes = [32, 32], strides = [1, 1]} : vector<64x32xf32> to vector<32x32xf32>
    %89 = vector.extract_strided_slice %87 {offsets = [32, 0], sizes = [32, 32], strides = [1, 1]} : vector<64x32xf32> to vector<32x32xf32>
    %90 = tpu.concatenate %88, %89, %1 in 1 : vector<32x32xf32>, vector<32x32xf32>, vector<32x32xf32> -> vector<32x96xf32>
    %cst_49 = arith.constant dense<0.000000e+00> : vector<32x64xf32>
    %91 = tpu.matmul %90, %16, %cst_49 {dimension_numbers = #tpu.dot_dimension_numbers<[1], [0], [0], [1], [0, 0, 1, 1], [], []>} : vector<32x96xf32>, vector<96x64xf32>, vector<32x64xf32> -> vector<32x64xf32>
    %92 = vector.broadcast %24 : vector<1x64xf32> to vector<32x64xf32>
    %93 = arith.addf %91, %92 : vector<32x64xf32>
    %cst_50 = arith.constant dense<0.000000e+00> : vector<32xf32>
    %94 = vector.multi_reduction <add>, %93, %cst_50 [1] : vector<32x64xf32> to vector<32xf32>
    %95 = vector.shape_cast %94 : vector<32xf32> to vector<32x1xf32>
    %cst_51 = arith.constant 6.400000e+01 : f32
    %96 = vector.broadcast %cst_51 : f32 to vector<32x1xf32>
    %97 = arith.divf %95, %96 : vector<32x1xf32>
    %98 = vector.broadcast %97 : vector<32x1xf32> to vector<32x64xf32>
    %99 = arith.subf %93, %98 : vector<32x64xf32>
    %100 = arith.mulf %99, %99 : vector<32x64xf32>
    %cst_52 = arith.constant dense<0.000000e+00> : vector<32xf32>
    %101 = vector.multi_reduction <add>, %100, %cst_52 [1] : vector<32x64xf32> to vector<32xf32>
    %102 = vector.shape_cast %101 : vector<32xf32> to vector<32x1xf32>
    %cst_53 = arith.constant 6.400000e+01 : f32
    %103 = vector.broadcast %cst_53 : f32 to vector<32x1xf32>
    %104 = arith.divf %102, %103 : vector<32x1xf32>
    %105 = vector.broadcast %97 : vector<32x1xf32> to vector<32x64xf32>
    %106 = arith.subf %93, %105 : vector<32x64xf32>
    %cst_54 = arith.constant 9.99999974E-6 : f32
    %107 = vector.broadcast %cst_54 : f32 to vector<32x1xf32>
    %108 = arith.addf %104, %107 : vector<32x1xf32>
    %109 = math.rsqrt %108 : vector<32x1xf32>
    %110 = vector.broadcast %109 : vector<32x1xf32> to vector<32x64xf32>
    %111 = arith.mulf %106, %110 : vector<32x64xf32>
    %112 = vector.broadcast %25 : vector<1x64xf32> to vector<32x64xf32>
    %113 = arith.mulf %111, %112 : vector<32x64xf32>
    %114 = vector.broadcast %26 : vector<1x64xf32> to vector<32x64xf32>
    %115 = arith.addf %113, %114 : vector<32x64xf32>
    %cst_55 = arith.constant 0.000000e+00 : f32
    %116 = vector.broadcast %cst_55 : f32 to vector<32x64xf32>
    %117 = arith.maximumf %115, %116 : vector<32x64xf32>
    %cst_56 = arith.constant dense<0.000000e+00> : vector<32x32xf32>
    %118 = tpu.matmul %117, %17, %cst_56 {dimension_numbers = #tpu.dot_dimension_numbers<[1], [0], [0], [1], [0, 0, 1, 1], [], []>} : vector<32x64xf32>, vector<64x32xf32>, vector<32x32xf32> -> vector<32x32xf32>
    %119 = vector.broadcast %27 : vector<1x32xf32> to vector<32x32xf32>
    %120 = arith.addf %118, %119 : vector<32x32xf32>
    %cst_57 = arith.constant dense<0.000000e+00> : vector<32xf32>
    %121 = vector.multi_reduction <add>, %120, %cst_57 [1] : vector<32x32xf32> to vector<32xf32>
    %122 = vector.shape_cast %121 : vector<32xf32> to vector<32x1xf32>
    %cst_58 = arith.constant 3.200000e+01 : f32
    %123 = vector.broadcast %cst_58 : f32 to vector<32x1xf32>
    %124 = arith.divf %122, %123 : vector<32x1xf32>
    %125 = vector.broadcast %124 : vector<32x1xf32> to vector<32x32xf32>
    %126 = arith.subf %120, %125 : vector<32x32xf32>
    %127 = arith.mulf %126, %126 : vector<32x32xf32>
    %cst_59 = arith.constant dense<0.000000e+00> : vector<32xf32>
    %128 = vector.multi_reduction <add>, %127, %cst_59 [1] : vector<32x32xf32> to vector<32xf32>
    %129 = vector.shape_cast %128 : vector<32xf32> to vector<32x1xf32>
    %cst_60 = arith.constant 3.200000e+01 : f32
    %130 = vector.broadcast %cst_60 : f32 to vector<32x1xf32>
    %131 = arith.divf %129, %130 : vector<32x1xf32>
    %132 = vector.broadcast %124 : vector<32x1xf32> to vector<32x32xf32>
    %133 = arith.subf %120, %132 : vector<32x32xf32>
    %cst_61 = arith.constant 9.99999974E-6 : f32
    %134 = vector.broadcast %cst_61 : f32 to vector<32x1xf32>
    %135 = arith.addf %131, %134 : vector<32x1xf32>
    %136 = math.rsqrt %135 : vector<32x1xf32>
    %137 = vector.broadcast %136 : vector<32x1xf32> to vector<32x32xf32>
    %138 = arith.mulf %133, %137 : vector<32x32xf32>
    %139 = vector.broadcast %28 : vector<1x32xf32> to vector<32x32xf32>
    %140 = arith.mulf %138, %139 : vector<32x32xf32>
    %141 = vector.broadcast %29 : vector<1x32xf32> to vector<32x32xf32>
    %142 = arith.addf %140, %141 : vector<32x32xf32>
    %143 = math.tanh %142 : vector<32x32xf32>
    %144 = arith.addf %143, %1 : vector<32x32xf32>
    %c0_62 = arith.constant 0 : index
    %c0_63 = arith.constant 0 : index
    %145 = vector.load %arg10[%c0_62, %c0_63] : memref<16x32xf32, #tpu.memory_space<vmem>>, vector<16x32xf32>
    tpu.vector_store %arg10[%c0_62, %c0_63], %86 {strides = array<i32>} : memref<16x32xf32, #tpu.memory_space<vmem>>, vector<16x32xf32>,
    %c0_64 = arith.constant 0 : index
    %c0_65 = arith.constant 0 : index
    %146 = vector.load %arg11[%c0_64, %c0_65] : memref<32x32xf32, #tpu.memory_space<vmem>>, vector<32x32xf32>
    tpu.vector_store %arg11[%c0_64, %c0_65], %144 {strides = array<i32>} : memref<32x32xf32, #tpu.memory_space<vmem>>, vector<32x32xf32>,
    return
  }
}

</mosaic_0001>

<bundles_post_ra>
// kernel: interaction_gnn_cell.1
= control target key start
LH: loop header
LB: loop body
LE: loop exit
PB: predicated region body
PF: predicated region fallthrough
CT: control target
= control target key end

     0   :  { %17 = vsyncpa [#allocation3], 0  ;;  %s3433_s0 = inlined_call_operand.vmem [shape: s32[1,32], index: 0, kind: input, shape index: {}]   ;;  %s3434_s1 = inlined_call_operand.vmem [shape: s32[64,1], index: 1, kind: input, shape index: {}]   ;;  %s3435_s2 = inlined_call_operand.hbm [shape: f32[16,32], index: 2, kind: input, shape index: {}, may-alias: {2,10}]   ;;  %s3436_s3 = inlined_call_operand.hbm [shape: f32[32,32], index: 3, kind: input, shape index: {}, may-alias: {3,11}]   ;;  %s3437_s4 = inlined_call_operand.vmem [shape: f32[64,64], index: 4, kind: input, shape index: {}]   ;;  %s3438_s5 = inlined_call_operand.vmem [shape: f32[64,32], index: 5, kind: input, shape index: {}]   ;;  %s3439_s6 = inlined_call_operand.vmem [shape: f32[6,64], index: 6, kind: input, shape index: {}]   ;;  %s3440_s7 = inlined_call_operand.vmem [shape: f32[96,64], index: 7, kind: input, shape index: {}]   ;;  %s3441_s8 = inlined_call_operand.vmem [shape: f32[64,32], index: 8, kind: input, shape index: {}]   ;;  %s3442_s9 = inlined_call_operand.vmem [shape: f32[6,64], index: 9, kind: input, shape index: {}]   ;;  %s3443_s10 = inlined_call_operand.hbm [shape: f32[16,32], index: 10, kind: output, shape index: {0}, may-alias: {2,10}]   ;;  %s3444_s11 = inlined_call_operand.hbm [shape: f32[32,32], index: 11, kind: output, shape index: {1}, may-alias: {3,11}]  }
   0x1   :  { %18 = vsyncpa [#allocation6], 0 }
   0x2   :  { %19 = vsyncpa [#allocation4], 0 }
   0x3   :  { %20 = vsyncpa [#allocation9], 0  ;;  %s2810_s17 = smov [#allocation2]  }
   0x4   :  { %s30_s18 = sshll.u32 %s2810_s17, 4  ;;  %s31_s18 = int_to_ptr.vmem [resolvable:$true] %s30_s18 }
   0x5   :  { %s2730_s19 = scalar_lea.vmem %s31_s18, 256  ;;  %p2735_p1 = scmp.lt.s32.totalorder %s31_s18, %s31_s18 }
   0x6   :  { %p2731_p0 = scmp.ne.s32.totalorder %s31_s18, %s2730_s19  ;;  %p2736_p2 = scmp.lt.s32.totalorder %s2730_s19, %s2730_s19 }
   0x8   :  { %p2737_p3 = por %p2736_p2, %p2735_p1 }
   0xa   :  { %p2738_p4 = pnand %p2737_p3, %p2731_p0 }
   0xc   :  { %2741 = shalt.err (!%p2738_p4)
}
   0xd   :  { %s2811_s20 = smov 128   ;;  %s2812_s21 = smov 8  }
   0xe   :  { %36 = dma.hbm_to_vmem [thread:$0]  %s3435_s2, 256, %s31_s18, [#allocation3], %s2811_s20, %s2811_s20, %s2812_s21  }
   0xf   :  { %s2813_s24 = smov [#allocation5]  }
  0x10   :  { %s42_s25 = sshll.u32 %s2813_s24, 4  ;;  %s43_s25 = int_to_ptr.vmem [resolvable:$true] %s42_s25 }
  0x11   :  { %s2750_s26 = scalar_lea.vmem %s43_s25, 512  ;;  %p2755_p6 = scmp.lt.s32.totalorder %s43_s25, %s43_s25 }
  0x12   :  { %p2751_p5 = scmp.ne.s32.totalorder %s43_s25, %s2750_s26  ;;  %p2756_p7 = scmp.lt.s32.totalorder %s2750_s26, %s2750_s26 }
  0x14   :  { %p2757_p8 = por %p2756_p7, %p2755_p6 }
  0x16   :  { %p2758_p9 = pnand %p2757_p8, %p2751_p5 }
  0x18   :  { %2761 = shalt.err (!%p2758_p9)
}
  0x19   :  { %48 = dma.hbm_to_vmem [thread:$0]  %s3436_s3, 512, %s43_s25, [#allocation6], %s2811_s20, %s2811_s20, %s2812_s21  }
  0x1a   :  { %2802 = dma.done.wait [#allocation3], 256  }
  0x1b   :  { %2803 = vsyncadd [#allocation3], 4294967040 }
  0x1c   :  { %2804 = dma.done.wait [#allocation6], 512  }
  0x1d   :  { %2805 = vsyncadd [#allocation6], 4294966784  ;;  %v74_v0 = vlaneseq  ;;  %v72_v3 = vld [vmem:[#allocation5 + $0x18] sm:$0xff]  ;;  %v71_v4 = vld [vmem:[#allocation5 + $0x10] sm:$0xff]  ;;  %vm193_vm0 = vcmask 261120   ;;  %v2814_v13 = vmov 0.0  }
  0x1e   :  { %v2893_v5 = vld [vmem:[#allocation5 + $0x8] sm:$0xff]  ;;  %v2895_v6 = vand.u32 4294901760, %v72_v3  ;;  %v2897_v7 = vand.u32 4294901760, %v71_v4  ;;  %v2902_v9 = vld [vmem:[#allocation5] sm:$0xff]  ;;  %v2209_v10 = vld [vmem:[%s3433_s0] ss:$0 sm:$0xff] }
  0x1f   :  { %v75_v1 = vshrl.u32 %v74_v0, 7  ;;  %v2900_v8 = vand.u32 4294901760, %v2893_v5  ;;  %v2908_v11 = vand.u32 4294901760, %v2902_v9  ;;  %v152_v41 = vld [vmem:[%s3437_s4 + $0x38] sm:$0xff]  ;;  %v151_v42 = vld [vmem:[%s3437_s4 + $0x30] sm:$0xff]  ;;  %v150_v43 = vld [vmem:[%s3437_s4 + $0x28] sm:$0xff] }
  0x20   :  { %2418 = vmatprep.subr.mxu0 %v2895_v6  ;;  %v315_v12 = vsub.f32 %v72_v3, %v2895_v6  ;;  %v322_v15 = vsub.f32 %v71_v4, %v2897_v7  ;;  %v149_v44 = vld [vmem:[%s3437_s4 + $0x20] sm:$0xff]  ;;  %v148_v45 = vld [vmem:[%s3437_s4 + $0x18] sm:$0xff]  ;;  %v147_v46 = vld [vmem:[%s3437_s4 + $0x10] sm:$0xff]  ;;  %s2815_s27 = smov 32   ;;  %vm742_vm3 = vcmask 523264   ;;  %vm993_vm4 = vcmask 130048  }
  0x21   :  { %v76_v2 = vadd.s32 8, %v75_v1  ;;  %vm81_vm1 = vcmp.eq.s32.totalorder %v75_v1, %v2209_v10  ;;  %2419 = vmatpush3.msra.mxu0 %v2895_v6  ;;  %v329_v19 = vsub.f32 %v2893_v5, %v2900_v8  ;;  %v336_v20 = vsub.f32 %v2902_v9, %v2908_v11  ;;  %v146_v55 = vld [vmem:[%s3437_s4 + $0x8] sm:$0xff]  ;;  %v145_v56 = vld [vmem:[%s3437_s4] sm:$0xff] }
  0x22   :  { %v2913_v14 = vsel %vm81_vm1, 1.0, %v2814_v13  ;;  %2420 = vmatprep.subr.mxu0 %v2897_v7  ;;  %v316_v21 = vand.u32 4294901760, %v315_v12  ;;  %v323_v23 = vand.u32 4294901760, %v322_v15  ;;  %vm1822_vm13 = vcmask 785408  }
  0x23   :  { %vm82_vm2 = vcmp.eq.s32.totalorder %v76_v2, %v2209_v10  ;;  %v195_v17 = vsel %vm193_vm0, %v2913_v14, 0  ;;  %2437 = vmatprep.mubr.msk.f32.mxu1 %vm193_vm0, %v2913_v14  ;;  %2421 = vmatpush3.msra.mxu0 %v2897_v7  ;;  %v330_v25 = vand.u32 4294901760, %v329_v19  ;;  %v337_v26 = vand.u32 4294901760, %v336_v20  ;;  %v2988_v10 = vld [vmem:[#allocation2] sm:$0xff] }
  0x24   :  { %v2917_v16 = vsel %vm82_vm2, 1.0, %v2814_v13  ;;  %v270_v22 = vsub.f32 %v195_v17, %v195_v17  ;;  %2422 = vmatprep.subr.mxu0 %v2900_v8  ;;  %v317_v27 = vsub.f32 %v315_v12, %v316_v21  ;;  %v324_v29 = vsub.f32 %v322_v15, %v323_v23 }
  0x25   :  { %v198_v18 = vsel %vm193_vm0, %v2917_v16, 0  ;;  %2423 = vmatpush3.msra.mxu0 %v2900_v8  ;;  %v331_v31 = vsub.f32 %v329_v19, %v330_v25  ;;  %v338_v32 = vsub.f32 %v336_v20, %v337_v26 }
  0x26   :  { %v280_v24 = vsub.f32 %v198_v18, %v198_v18  ;;  %v271_v28 = vand.u32 4294901760, %v270_v22  ;;  %2424 = vmatprep.subr.mxu0 %v2908_v11  ;;  %v318_v33 = vand.u32 4294901760, %v317_v27  ;;  %v325_v35 = vand.u32 4294901760, %v324_v29  ;;  %v2226_v18 = vld [vmem:[%s3439_s6] ss:$0 sm:$0xff] }
  0x27   :  { %2425 = vmatpush3.msra.mxu0 %v2908_v11  ;;  %v332_v39 = vand.u32 4294901760, %v331_v31  ;;  %v339_v40 = vand.u32 4294901760, %v338_v32 }
  0x28   :  { %v281_v30 = vand.u32 4294901760, %v280_v24  ;;  %v272_v34 = vsub.f32 %v270_v22, %v271_v28  ;;  %2429 = vmatprep.subr.mxu1 %v318_v33  ;;  %2440 = vmatprep.subr.mxu0 %v315_v12 }
  0x29   :  { %2430 = vmatpush3.msra.mxu1 %v318_v33 }
  0x2a   :  { %v282_v36 = vsub.f32 %v280_v24, %v281_v30  ;;  %v273_v37 = vand.u32 4294901760, %v272_v34  ;;  %2431 = vmatprep.subr.mxu1 %v325_v35  ;;  %v160_v34 = vld [vmem:[%s3438_s5 + $0x38] sm:$0xff] }
  0x2b   :  { %2432 = vmatpush3.msra.mxu1 %v325_v35  ;;  %v159_v35 = vld [vmem:[%s3438_s5 + $0x30] sm:$0xff] }
  0x2c   :  { %v283_v38 = vand.u32 4294901760, %v282_v36  ;;  %2426 = vmatprep.mubr.f32.mxu0 %v273_v37  ;;  %2433 = vmatprep.subr.mxu1 %v332_v39  ;;  %v158_v36 = vld [vmem:[%s3438_s5 + $0x28] sm:$0xff]  ;;  %v157_v37 = vld [vmem:[%s3438_s5 + $0x20] sm:$0xff] }
  0x2d   :  { %2434 = vmatpush3.msra.mxu1 %v332_v39  ;;  %v155_v39 = vld [vmem:[%s3438_s5 + $0x10] sm:$0xff] }
  0x2e   :  { %2427 = vmatmul.mubr.f32.vlgmr.msra.gmra.mxu0 %v283_v38  ;;  %2435 = vmatprep.subr.mxu1 %v339_v40  ;;  %v156_v38 = vld [vmem:[%s3438_s5 + $0x18] sm:$0xff] }
  0x2f   :  { %2441 = vmatpush3.msra.mxu0 %v315_v12  ;;  %2436 = vmatpush3.msra.mxu1 %v339_v40  ;;  %v154_v40 = vld [vmem:[%s3438_s5 + $0x8] sm:$0xff] }
  0x30   :  { %2442 = vmatprep.subr.mxu0 %v322_v15  ;;  %2438 = vmatmul.mubr.msk.f32.vlgmr.msra.gmra.mxu1 %vm193_vm0, %v2917_v16 }
  0x31   :  { %2443 = vmatpush3.msra.mxu0 %v322_v15  ;;  %2451 = vmatprep.subr.mxu1 %v2895_v6 }
  0x32   :  { %2444 = vmatprep.subr.mxu0 %v329_v19  ;;  %2448 = vmatprep.mubr.f32.mxu0 %v270_v22 }
  0x33   :  { %2445 = vmatpush3.msra.mxu0 %v329_v19  ;;  %2452 = vmatpush3.msra.mxu1 %v2895_v6 }
  0x34   :  { %2446 = vmatprep.subr.mxu0 %v336_v20  ;;  %2453 = vmatprep.subr.mxu1 %v2897_v7 }
  0x35   :  { %2447 = vmatpush3.msra.mxu0 %v336_v20  ;;  %2454 = vmatpush3.msra.mxu1 %v2897_v7 }
  0x36   :  { %2449 = vmatmul.mubr.f32.vlgmr.msra.gmra.mxu0 %v280_v24  ;;  %2462 = vmatprep.subr.mxu0 %v316_v21 }
  0x37   :  { %2463 = vmatpush3.msra.mxu0 %v316_v21  ;;  %2455 = vmatprep.subr.mxu1 %v2900_v8 }
  0x38   :  { %2464 = vmatprep.subr.mxu0 %v323_v23  ;;  %2456 = vmatpush3.msra.mxu1 %v2900_v8 }
  0x39   :  { %2465 = vmatpush3.msra.mxu0 %v323_v23  ;;  %2457 = vmatprep.subr.mxu1 %v2908_v11 }
  0x3a   :  { %2466 = vmatprep.subr.mxu0 %v330_v25  ;;  %2458 = vmatpush3.msra.mxu1 %v2908_v11 }
  0x3b   :  { %2459 = vmatprep.mubr.f32.mxu1 %v271_v28  ;;  %2467 = vmatpush3.msra.mxu0 %v330_v25 }
  0x3c   :  { %2460 = vmatmul.mubr.f32.vlgmr.msra.gmra.mxu1 %v281_v30  ;;  %2468 = vmatprep.subr.mxu0 %v337_v26 }
  0x3d   :  { %2473 = vmatprep.subr.mxu1 %v2895_v6  ;;  %2469 = vmatpush3.msra.mxu0 %v337_v26 }
  0x3e   :  { %2470 = vmatprep.mubr.msk.f32.mxu0 %vm193_vm0, %v2913_v14  ;;  %2474 = vmatpush3.msra.mxu1 %v2895_v6 }
  0x3f   :  { %2471 = vmatmul.mubr.msk.f32.vlgmr.msra.gmra.mxu0 %vm193_vm0, %v2917_v16  ;;  %2475 = vmatprep.subr.mxu1 %v2897_v7 }
  0x40   :  { %2481 = vmatprep.mubr.msk.f32.mxu1 %vm193_vm0, %v2913_v14  ;;  %2476 = vmatpush3.msra.mxu1 %v2897_v7  ;;  %v2993_v14 = vld [vmem:[#allocation2 + $0x8] sm:$0xff] }
  0x41   :  { %2477 = vmatprep.subr.mxu1 %v2900_v8  ;;  %2484 = vmatprep.subr.mxu0 %v152_v41 }
  0x42   :  { %2478 = vmatpush3.msra.mxu1 %v2900_v8  ;;  %2485 = vmatpush3.msra.mxu0 %v152_v41  ;;  %v153_v41 = vld [vmem:[%s3438_s5] sm:$0xff]  ;;  %s2818_s5 = smov [#allocation7]  }
  0x43   :  { %2479 = vmatprep.subr.mxu1 %v2908_v11  ;;  %2486 = vmatprep.subr.mxu0 %v151_v42  ;;  %s2180_s2 = sshll.u32 %s2818_s5, 4  ;;  %s2181_s2 = int_to_ptr.vmem [resolvable:$true] %s2180_s2 }
  0x44   :  { %2480 = vmatpush3.msra.mxu1 %v2908_v11  ;;  %2487 = vmatpush3.msra.mxu0 %v151_v42  ;;  %p2767_p11 = scmp.lt.s32.totalorder %s2181_s2, %s2181_s2 }
  0x45   :  { %2482 = vmatmul.mubr.msk.f32.vlgmr.msra.gmra.mxu1 %vm193_vm0, %v2917_v16  ;;  %2488 = vmatprep.subr.mxu0 %v150_v43 }
  0x46   :  { %2489 = vmatpush3.msra.mxu0 %v150_v43  ;;  %2503 = vmatprep.subr.mxu1 %v160_v34 }
  0x47   :  { %2490 = vmatprep.subr.mxu0 %v149_v44  ;;  %2504 = vmatpush3.msra.mxu1 %v160_v34 }
  0x48   :  { %2491 = vmatpush3.msra.mxu0 %v149_v44  ;;  %2505 = vmatprep.subr.mxu1 %v159_v35 }
  0x49   :  { %2492 = vmatprep.subr.mxu0 %v148_v45  ;;  %2506 = vmatpush3.msra.mxu1 %v159_v35 }
  0x4a   :  { %2493 = vmatpush3.msra.mxu0 %v148_v45  ;;  %2507 = vmatprep.subr.mxu1 %v158_v36 }
  0x4b   :  { %2494 = vmatprep.subr.mxu0 %v147_v46  ;;  %2508 = vmatpush3.msra.mxu1 %v158_v36 }
  0x4c   :  { %2495 = vmatpush3.msra.mxu0 %v147_v46  ;;  %2509 = vmatprep.subr.mxu1 %v157_v37 }
  0x4d   :  { %2496 = vmatprep.subr.mxu0 %v146_v55  ;;  %2510 = vmatpush3.msra.mxu1 %v157_v37 }
  0x4e   :  { %2497 = vmatpush3.msra.mxu0 %v146_v55  ;;  %2511 = vmatprep.subr.mxu1 %v156_v38 }
  0x4f   :  { %2498 = vmatprep.subr.mxu0 %v145_v56  ;;  %2512 = vmatpush3.msra.mxu1 %v156_v38  ;;  %v89_v38 = vld [vmem:[%s3434_s1 + $0x10] sm:$0xff] }
  0x50   :  { %2499 = vmatpush3.msra.mxu0 %v145_v56  ;;  %2513 = vmatprep.subr.mxu1 %v155_v39 }
  0x51   :  { %2514 = vmatpush3.msra.mxu1 %v155_v39  ;;  %v90_v39 = vld [vmem:[%s3434_s1 + $0x18] sm:$0xff] }
  0x52   :  { %2515 = vmatprep.subr.mxu1 %v154_v40 }
  0x53   :  { %2516 = vmatpush3.msra.mxu1 %v154_v40  ;;  %v91_v40 = vld [vmem:[%s3434_s1 + $0x20] sm:$0xff] }
  0x54   :  { %2517 = vmatprep.subr.mxu1 %v153_v41 }
  0x55   :  { %2518 = vmatpush3.msra.mxu1 %v153_v41  ;;  %v92_v41 = vld [vmem:[%s3434_s1 + $0x28] sm:$0xff] }
  0xee   :  { %v2428_v47 = vpop.f32.mrf.mxu0 }
  0xf0   :  { %v275_v48 = vpop.f32.mrf.mxu0  ;;  %v2439_v49 = vpop.f32.mrf.mxu1 }
  0xf1   :  { %v383_v59 = vadd.f32 %v2439_v49, %v2428_v47  ;;  %v2229_v49 = vld [vmem:[%s3439_s6 + $0x1] ss:$0 sm:$0xff] }
  0xf2   :  { %v376_v50 = vpop.f32.mrf.mxu1 }
  0xf3   :  { %v377_v53 = vadd.f32 %v376_v50, %v275_v48 }
  0xf6   :  { %v2450_v51 = vpop.f32.mrf.mxu0 }
  0xf7   :  { %v470_v63 = vadd.f32 %v2450_v51, %v383_v59  ;;  %v2230_v51 = vld [vmem:[%s3439_s6 + $0x2] ss:$0 sm:$0xff] }
  0xf8   :  { %v462_v54 = vpop.f32.mrf.mxu0 }
  0xf9   :  { %v463_v60 = vadd.f32 %v462_v54, %v377_v53 }
  0xfc   :  { %v2461_v52 = vpop.f32.mrf.mxu1 }
  0xfd   :  { %v555_v2 = vadd.f32 %v2461_v52, %v470_v63 }
  0xfe   :  { %v546_v57 = vpop.f32.mrf.mxu1 }
  0xff   :  { %v2472_v58 = vpop.f32.mrf.mxu0  ;;  %v547_v61 = vadd.f32 %v546_v57, %v463_v60  ;;  %v2816_v60 = vmov 0  }
 0x100   :  { %v644_v7 = vadd.f32 %v2472_v58, %v555_v2  ;;  %2684 = vset.pattern.permute.xlu1 %v2816_v60  ;;  %2685 = vset.pattern.permute.xlu0 %v2816_v60 }
 0x101   :  { %v637_v62 = vpop.f32.mrf.mxu0 }
 0x102   :  { %v638_v3 = vadd.f32 %v637_v62, %v547_v61  ;;  %v2231_v61 = vld [vmem:[%s3439_s6 + $0x3] ss:$0 sm:$0xff] }
 0x105   :  { %v2483_v1 = vpop.f32.mrf.mxu1 }
 0x106   :  { %v725_v8 = vadd.f32 %v2483_v1, %v644_v7  ;;  %v87_v7 = vld [vmem:[%s3434_s1] sm:$0xff] }
 0x107   :  { %v718_v4 = vpop.f32.mrf.mxu1 }
 0x108   :  { %v719_v6 = vadd.f32 %v718_v4, %v638_v3 }
 0x10a   :  { %730 = vrot.lane.b32.xlu0 %v719_v6, %s2815_s27  ;;  %v93_v6 = vld [vmem:[%s3434_s1 + $0x30] sm:$0xff] }
 0x10e   :  { %732 = vrot.lane.b32.xlu0 %v725_v8, %s2815_s27  ;;  %v88_v8 = vld [vmem:[%s3434_s1 + $0x8] sm:$0xff] }
 0x17c   :  { %v731_v11 = vpop.permute.xlu0 %730 }
 0x17d   :  { %v736_v12 = vsel %vm193_vm0, %v2988_v10, %v731_v11  ;;  %v94_v11 = vld [vmem:[%s3434_s1 + $0x38] sm:$0xff] }
 0x17e   :  { %2500 = vmatprep.mubr.msk.f32.mxu0 %vm742_vm3, %v736_v12 }
 0x180   :  { %v733_v15 = vpop.permute.xlu0 %732 }
 0x181   :  { %v737_v16 = vsel %vm193_vm0, %v2993_v14, %v733_v15 }
 0x182   :  { %2501 = vmatmul.mubr.msk.f32.vlgmr.msra.gmra.mxu0 %vm742_vm3, %v737_v16 }
 0x242   :  { %v2502_v17 = vpop.f32.mrf.mxu0 }
 0x243   :  { %v821_v21 = vadd.f32 %v2502_v17, %v2226_v18 }
 0x244   :  { %v815_v19 = vpop.f32.mrf.mxu0 }
 0x245   :  { %v816_v20 = vadd.f32 %v2226_v18, %v815_v19  ;;  %v827_v23 = vsel %vm742_vm3, %v821_v21, 0.0  ;;  %v3055_v18 = vand.u32 127, %v74_v0 }
 0x247   :  { %v824_v22 = vsel %vm742_vm3, %v816_v20, 0.0 }
 0x248   :  { %825 = vadd.xlane.f32.xlu1 %v824_v22 }
 0x24c   :  { %828 = vadd.xlane.f32.xlu1 %v827_v23 }
 0x2d1   :  { %v826_v24 = vpop.xlane.xlu1 %825 }
 0x2d2   :  { %v831_v25 = vmul.f32 0.015625, %v826_v24 }
 0x2d4   :  { %v833_v26 = vsub.f32 %v816_v20, %v831_v25 }
 0x2d5   :  { %v829_v27 = vpop.xlane.xlu1 %828 }
 0x2d6   :  { %v832_v28 = vmul.f32 0.015625, %v829_v27  ;;  %v835_v29 = vmul.f32 %v833_v26, %v833_v26 }
 0x2d8   :  { %v834_v30 = vsub.f32 %v821_v21, %v832_v28  ;;  %v837_v31 = vsel %vm742_vm3, %v835_v29, 0.0 }
 0x2d9   :  { %838 = vadd.xlane.f32.xlu0 %v837_v31 }
 0x2da   :  { %v836_v32 = vmul.f32 %v834_v30, %v834_v30 }
 0x2dc   :  { %v840_v33 = vsel %vm742_vm3, %v836_v32, 0.0 }
 0x2dd   :  { %841 = vadd.xlane.f32.xlu1 %v840_v33 }
 0x2ef   :  { %119 = vperm.xlu0 %2685, %v94_v11  }
 0x362   :  { %v839_v42 = vpop.xlane.xlu0 %838 }
 0x363   :  { %v843_v43 = vmul.f32 0.015625, %v839_v42 }
 0x365   :  { %v845_v44 = vadd.f32 1e-05, %v843_v43 }
 0x366   :  { %v842_v45 = vpop.xlane.xlu1 %841 }
 0x367   :  { %2686 = vrsqrt.f32 %v845_v44  ;;  %v844_v46 = vmul.f32 0.015625, %v842_v45 }
 0x369   :  { %v846_v47 = vadd.f32 1e-05, %v844_v46 }
 0x36b   :  { %2688 = vrsqrt.f32 %v846_v47 }
 0x374   :  { %v2687_v48 = vpop.eup %2686 }
 0x375   :  { %v849_v50 = vmul.f32 %v2687_v48, %v833_v26 }
 0x377   :  { %v855_v52 = vmul.f32 %v2229_v49, %v849_v50  ;;  %v120_v50 = vpop.permute.xlu0 %119 }
 0x378   :  { %v2689_v53 = vpop.eup %2688  ;;  %vm128_vm7 = vcmp.eq.s32.totalorder %v3055_v18, %v120_v50 }
 0x379   :  { %v850_v54 = vmul.f32 %v2689_v53, %v834_v30  ;;  %v861_v55 = vadd.f32 %v2230_v51, %v855_v52  ;;  %v3102_v52 = vsel %vm128_vm7, 1.0, %v2814_v13 }
 0x37b   :  { %v856_v56 = vmul.f32 %v2229_v49, %v850_v54  ;;  %v863_v57 = vmax.f32 %v861_v55, 0.0  ;;  %v1016_v55 = vsel %vm993_vm4, %v3102_v52, 0 }
 0x37d   :  { %v862_v58 = vadd.f32 %v2230_v51, %v856_v56  ;;  %2519 = vmatprep.mubr.msk.f32.mxu1 %vm742_vm3, %v863_v57  ;;  %v2234_v57 = vld [vmem:[%s3439_s6 + $0x4] ss:$0 sm:$0xff] }
 0x37f   :  { %v864_v59 = vmax.f32 %v862_v58, 0.0 }
 0x381   :  { %2520 = vmatmul.mubr.msk.f32.vlgmr.msra.gmra.mxu1 %vm742_vm3, %v864_v59 }
 0x441   :  { %v2521_v62 = vpop.f32.mrf.mxu1 }
 0x442   :  { %v947_v63 = vadd.f32 %v2521_v62, %v2231_v61 }
 0x443   :  { %v941_v1 = vpop.f32.mrf.mxu1 }
 0x444   :  { %v942_v2 = vadd.f32 %v2231_v61, %v941_v1  ;;  %v953_v3 = vsel %vm193_vm0, %v947_v63, 0.0  ;;  %v2235_v61 = vld [vmem:[%s3439_s6 + $0x5] ss:$0 sm:$0xff]  ;;  %s2817_s6 = smov 64  }
 0x445   :  { %954 = vadd.xlane.f32.xlu1 %v953_v3 }
 0x446   :  { %v950_v4 = vsel %vm193_vm0, %v942_v2, 0.0 }
 0x449   :  { %951 = vadd.xlane.f32.xlu1 %v950_v4 }
 0x45a   :  { %116 = vperm.xlu1 %2684, %v93_v6  }
 0x45e   :  { %98 = vperm.xlu1 %2684, %v87_v7  }
 0x462   :  { %101 = vperm.xlu1 %2684, %v88_v8  }
 0x4ce   :  { %v955_v12 = vpop.xlane.xlu1 %954 }
 0x4cf   :  { %v958_v15 = vmul.f32 0.03125, %v955_v12 }
 0x4d1   :  { %v960_v16 = vsub.f32 %v947_v63, %v958_v15  ;;  %v3123_v63 = vsub.f32 %v1016_v55, %v1016_v55 }
 0x4d2   :  { %v952_v17 = vpop.xlane.xlu1 %951 }
 0x4d3   :  { %v957_v19 = vmul.f32 0.03125, %v952_v17  ;;  %v962_v20 = vmul.f32 %v960_v16, %v960_v16  ;;  %v1157_v15 = vand.u32 4294901760, %v3123_v63 }
 0x4d5   :  { %v3057_v21 = vsub.f32 %v942_v2, %v957_v19  ;;  %v966_v22 = vsel %vm193_vm0, %v962_v20, 0.0 }
 0x4d6   :  { %967 = vadd.xlane.f32.xlu1 %v966_v22  ;;  %v117_v23 = vpop.permute.xlu1 %116 }
 0x4d7   :  { %v961_v24 = vmul.f32 %v3057_v21, %v3057_v21  ;;  %vm127_vm5 = vcmp.eq.s32.totalorder %v3055_v18, %v117_v23 }
 0x4d8   :  { %v3064_v25 = vsel %vm127_vm5, 1.0, %v2814_v13 }
 0x4d9   :  { %v963_v0 = vsel %vm193_vm0, %v961_v24, 0.0  ;;  %v1013_v26 = vsel %vm993_vm4, %v3064_v25, 0 }
 0x4da   :  { %964 = vadd.xlane.f32.xlu1 %v963_v0  ;;  %v3069_v27 = vsub.f32 %v1013_v26, %v1013_v26  ;;  %v99_v28 = vpop.permute.xlu1 %98  ;;  %v1158_v0 = vsub.f32 %v3123_v63, %v1157_v15 }
 0x4db   :  { %vm121_vm6 = vcmp.eq.s32.totalorder %v3055_v18, %v99_v28 }
 0x4dc   :  { %v3073_v29 = vsel %vm121_vm6, 1.0, %v2814_v13  ;;  %v1147_v30 = vand.u32 4294901760, %v3069_v27 }
 0x4dd   :  { %v995_v31 = vsel %vm993_vm4, %v3073_v29, 0 }
 0x4de   :  { %v3078_v32 = vsub.f32 %v995_v31, %v995_v31  ;;  %v1148_v33 = vsub.f32 %v3069_v27, %v1147_v30  ;;  %v102_v42 = vpop.permute.xlu1 %101 }
 0x4df   :  { %vm122_vm8 = vcmp.eq.s32.totalorder %v3055_v18, %v102_v42 }
 0x4e0   :  { %v1087_v34 = vand.u32 4294901760, %v3078_v32  ;;  %v1149_v35 = vand.u32 4294901760, %v1148_v33  ;;  %v3106_v53 = vsel %vm122_vm8, 1.0, %v2814_v13 }
 0x4e1   :  { %v998_v59 = vsel %vm993_vm4, %v3106_v53, 0 }
 0x4e2   :  { %v1088_v36 = vsub.f32 %v3078_v32, %v1087_v34  ;;  %2535 = vmatprep.mubr.f32.mxu1 %v1149_v35  ;;  %v3127_v4 = vsub.f32 %v998_v59, %v998_v59 }
 0x4e4   :  { %v1089_v37 = vand.u32 4294901760, %v1088_v36 }
 0x4e6   :  { %2526 = vmatprep.mubr.f32.mxu0 %v1089_v37 }
 0x4eb   :  { %104 = vperm.xlu1 %2684, %v89_v38  }
 0x4ef   :  { %107 = vperm.xlu1 %2684, %v90_v39  }
 0x4f3   :  { %110 = vperm.xlu1 %2684, %v91_v40   ;;  %v1159_v40 = vand.u32 4294901760, %v1158_v0 }
 0x4f7   :  { %113 = vperm.xlu1 %2684, %v92_v41  }
 0x4fb   :  { %1798 = vrot.lane.b32.xlu1 %v2902_v9, %s2817_s6  ;;  %v168_v9 = vld [vmem:[%s3440_s7 + $0x38] sm:$0xff] }
 0x4ff   :  { %1800 = vrot.lane.b32.xlu1 %v2893_v5, %s2817_s6  ;;  %v169_v5 = vld [vmem:[%s3440_s7 + $0x40] sm:$0xff] }
 0x55f   :  { %v968_v43 = vpop.xlane.xlu1 %967 }
 0x560   :  { %v970_v44 = vmul.f32 0.03125, %v968_v43 }
 0x562   :  { %v972_v45 = vadd.f32 1e-05, %v970_v44 }
 0x563   :  { %v965_v46 = vpop.xlane.xlu1 %964 }
 0x564   :  { %2690 = vrsqrt.f32 %v972_v45  ;;  %v969_v47 = vmul.f32 0.03125, %v965_v46 }
 0x566   :  { %v971_v48 = vadd.f32 1e-05, %v969_v47 }
 0x567   :  { %v105_v49 = vpop.permute.xlu1 %104 }
 0x568   :  { %2692 = vrsqrt.f32 %v971_v48  ;;  %vm123_vm9 = vcmp.eq.s32.totalorder %v3055_v18, %v105_v49 }
 0x569   :  { %v3114_v58 = vsel %vm123_vm9, 1.0, %v2814_v13 }
 0x56a   :  { %v1001_v2 = vsel %vm993_vm4, %v3114_v58, 0 }
 0x56b   :  { %v108_v51 = vpop.permute.xlu1 %107  ;;  %v3137_v12 = vsub.f32 %v1001_v2, %v1001_v2 }
 0x56c   :  { %vm124_vm10 = vcmp.eq.s32.totalorder %v3055_v18, %v108_v51 }
 0x56d   :  { %v3130_v6 = vsel %vm124_vm10, 1.0, %v2814_v13  ;;  %v1107_v26 = vand.u32 4294901760, %v3137_v12 }
 0x56e   :  { %v1004_v19 = vsel %vm993_vm4, %v3130_v6, 0 }
 0x56f   :  { %v111_v54 = vpop.permute.xlu1 %110  ;;  %v3149_v24 = vsub.f32 %v1004_v19, %v1004_v19 }
 0x570   :  { %vm125_vm11 = vcmp.eq.s32.totalorder %v3055_v18, %v111_v54 }
 0x571   :  { %v2691_v56 = vpop.eup %2690  ;;  %v3134_v11 = vsel %vm125_vm11, 1.0, %v2814_v13  ;;  %v1117_v38 = vand.u32 4294901760, %v3149_v24 }
 0x572   :  { %v976_v60 = vmul.f32 %v2691_v56, %v960_v16  ;;  %v1007_v20 = vsel %vm993_vm4, %v3134_v11, 0 }
 0x573   :  { %v114_v62 = vpop.permute.xlu1 %113  ;;  %v1118_v47 = vsub.f32 %v3149_v24, %v1117_v38 }
 0x574   :  { %v982_v1 = vmul.f32 %v2234_v57, %v976_v60  ;;  %vm126_vm12 = vcmp.eq.s32.totalorder %v3055_v18, %v114_v62  ;;  %v1097_v18 = vand.u32 4294901760, %v3127_v4 }
 0x575   :  { %v2693_v3 = vpop.eup %2692  ;;  %v3145_v22 = vsel %vm126_vm12, 1.0, %v2814_v13  ;;  %v3158_v13 = vsub.f32 %v1007_v20, %v1007_v20  ;;  %v1119_v55 = vand.u32 4294901760, %v1118_v47 }
 0x576   :  { %v988_v7 = vadd.f32 %v2235_v61, %v982_v1  ;;  %v975_v8 = vmul.f32 %v2693_v3, %v3057_v21  ;;  %v1098_v35 = vsub.f32 %v3127_v4, %v1097_v18 }
 0x577   :  { %v1127_v42 = vand.u32 4294901760, %v3158_v13 }
 0x578   :  { %v990_v16 = vmax.f32 %v988_v7, 0.0  ;;  %v981_v17 = vmul.f32 %v2234_v57, %v975_v8  ;;  %v1099_v43 = vand.u32 4294901760, %v1098_v35 }
 0x579   :  { %v1128_v50 = vsub.f32 %v3158_v13, %v1127_v42 }
 0x57a   :  { %v992_v21 = vadd.f32 %v990_v16, %v2993_v14  ;;  %v987_v23 = vadd.f32 %v2235_v61, %v981_v17  ;;  %v1010_v14 = vsel %vm993_vm4, %v3145_v22, 0 }
 0x57b   :  { %v3169_v37 = vsub.f32 %v1010_v14, %v1010_v14  ;;  %v1129_v57 = vand.u32 4294901760, %v1128_v50 }
 0x57c   :  { %v3155_v28 = vand.u32 4294901760, %v992_v21  ;;  %2170 = vst.msk [vmem:[#allocation7 + $0x8] sm:$0xff] %vm193_vm0, %v992_v21  ;;  %v989_v31 = vmax.f32 %v987_v23, 0.0 }
 0x57d   :  { %v1137_v48 = vand.u32 4294901760, %v3169_v37 }
 0x57e   :  { %v991_v33 = vadd.f32 %v989_v31, %v2988_v10  ;;  %2522 = vmatprep.subr.mxu0 %v3155_v28  ;;  %2670 = vmatprep.subr.mxu1 %v3155_v28  ;;  %v1195_v36 = vsub.f32 %v992_v21, %v3155_v28  ;;  %v1108_v10 = vsub.f32 %v3137_v12, %v1107_v26 }
 0x57f   :  { %2523 = vmatpush3.msra.mxu0 %v3155_v28  ;;  %2672 = vmatpush3.msra.mxu1 %v3155_v28  ;;  %v1138_v56 = vsub.f32 %v3169_v37, %v1137_v48 }
 0x580   :  { %v3177_v39 = vand.u32 4294901760, %v991_v33  ;;  %2169 = vst.msk [vmem:[#allocation7] sm:$0xff] %vm193_vm0, %v991_v33  ;;  %v1196_v41 = vand.u32 4294901760, %v1195_v36  ;;  %v1109_v46 = vand.u32 4294901760, %v1108_v10 }
 0x581   :  { %v1139_v60 = vand.u32 4294901760, %v1138_v56 }
 0x582   :  { %2524 = vmatprep.subr.mxu0 %v3177_v39  ;;  %2671 = vmatprep.subr.mxu1 %v3177_v39  ;;  %v1197_v44 = vsub.f32 %v1195_v36, %v1196_v41  ;;  %v1202_v45 = vsub.f32 %v991_v33, %v3177_v39 }
 0x583   :  { %2525 = vmatpush3.msra.mxu0 %v3177_v39  ;;  %2673 = vmatpush3.msra.mxu1 %v3177_v39 }
 0x584   :  { %2527 = vmatmul.mubr.f32.vlgmr.msra.gmra.mxu0 %v1099_v43  ;;  %2536 = vmatmul.mubr.f32.vlgmr.msra.gmra.mxu1 %v1159_v40  ;;  %v1198_v49 = vand.u32 4294901760, %v1197_v44  ;;  %v1203_v51 = vand.u32 4294901760, %v1202_v45 }
 0x585   :  { %2554 = vmatprep.subr.mxu0 %v1195_v36  ;;  %2529 = vmatprep.mubr.f32.mxu0 %v1109_v46 }
 0x586   :  { %2542 = vmatprep.mubr.msk.f32.mxu1 %vm993_vm4, %v3073_v29  ;;  %2555 = vmatpush3.msra.mxu0 %v1195_v36  ;;  %v1204_v54 = vsub.f32 %v1202_v45, %v1203_v51 }
 0x587   :  { %2538 = vmatprep.subr.mxu1 %v1198_v49  ;;  %2556 = vmatprep.subr.mxu0 %v1202_v45 }
 0x588   :  { %2539 = vmatpush3.msra.mxu1 %v1198_v49  ;;  %2557 = vmatpush3.msra.mxu0 %v1202_v45  ;;  %v1205_v59 = vand.u32 4294901760, %v1204_v54 }
 0x589   :  { %2530 = vmatmul.mubr.f32.gmra.mxu0 %v1119_v55  ;;  %2586 = vmatprep.subr.mxu0 %v1196_v41 }
 0x58a   :  { %2532 = vmatprep.mubr.f32.mxu0 %v1129_v57  ;;  %2540 = vmatprep.subr.mxu1 %v1205_v59 }
 0x58b   :  { %2541 = vmatpush3.msra.mxu1 %v1205_v59  ;;  %v163_v59 = vld [vmem:[%s3440_s7 + $0x10] sm:$0xff] }
 0x58c   :  { %2543 = vmatmul.mubr.msk.f32.vlgmr.msra.gmra.mxu1 %vm993_vm4, %v3106_v53  ;;  %2570 = vmatprep.subr.mxu1 %v3155_v28 }
 0x58d   :  { %2533 = vmatmul.mubr.f32.gmra.mxu0 %v1139_v60  ;;  %2545 = vmatprep.mubr.msk.f32.mxu1 %vm993_vm4, %v3114_v58  ;;  %v162_v60 = vld [vmem:[%s3440_s7 + $0x8] sm:$0xff] }
 0x58e   :  { %2558 = vmatprep.mubr.f32.mxu0 %v3078_v32  ;;  %2571 = vmatpush3.msra.mxu1 %v3155_v28  ;;  %v166_v32 = vld [vmem:[%s3440_s7 + $0x28] sm:$0xff] }
 0x58f   :  { %2572 = vmatprep.subr.mxu1 %v3177_v39 }
 0x590   :  { %2573 = vmatpush3.msra.mxu1 %v3177_v39 }
 0x591   :  { %2546 = vmatmul.mubr.msk.f32.gmra.mxu1 %vm993_vm4, %v3130_v6  ;;  %2559 = vmatmul.mubr.f32.vlgmr.msra.gmra.mxu0 %v3127_v4 }
 0x592   :  { %2587 = vmatpush3.msra.mxu0 %v1196_v41  ;;  %2602 = vmatprep.subr.mxu1 %v3155_v28 }
 0x593   :  { %2548 = vmatprep.mubr.msk.f32.mxu1 %vm993_vm4, %v3134_v11  ;;  %2561 = vmatprep.mubr.f32.mxu0 %v3137_v12 }
 0x594   :  { %2588 = vmatprep.subr.mxu0 %v1203_v51 }
 0x595   :  { %2589 = vmatpush3.msra.mxu0 %v1203_v51  ;;  %2549 = vmatmul.mubr.msk.f32.gmra.mxu1 %vm993_vm4, %v3145_v22 }
 0x596   :  { %2562 = vmatmul.mubr.f32.gmra.mxu0 %v3149_v24  ;;  %2551 = vmatprep.mubr.msk.f32.mxu1 %vm993_vm4, %v3064_v25 }
 0x597   :  { %2564 = vmatprep.mubr.f32.mxu0 %v3158_v13 }
 0x599   :  { %2552 = vmatmul.mubr.msk.f32.gmra.mxu1 %vm993_vm4, %v3102_v52 }
 0x59a   :  { %2565 = vmatmul.mubr.f32.gmra.mxu0 %v3169_v37  ;;  %2574 = vmatprep.mubr.f32.mxu1 %v1087_v34  ;;  %v165_v34 = vld [vmem:[%s3440_s7 + $0x20] sm:$0xff] }
 0x59b   :  { %2567 = vmatprep.mubr.f32.mxu0 %v3069_v27  ;;  %v172_v27 = vld [vmem:[%s3440_s7 + $0x58] sm:$0xff] }
 0x59c   :  { %2618 = vmatprep.subr.mxu0 %v172_v27 }
 0x59d   :  { %2575 = vmatmul.mubr.f32.vlgmr.msra.gmra.mxu1 %v1097_v18 }
 0x59e   :  { %2568 = vmatmul.mubr.f32.gmra.mxu0 %v3123_v63  ;;  %2603 = vmatpush3.msra.mxu1 %v3155_v28 }
 0x59f   :  { %2577 = vmatprep.mubr.f32.mxu1 %v1107_v26  ;;  %2590 = vmatprep.mubr.msk.f32.mxu0 %vm993_vm4, %v3073_v29 }
 0x5a0   :  { %2604 = vmatprep.subr.mxu1 %v3177_v39 }
 0x5a1   :  { %2605 = vmatpush3.msra.mxu1 %v3177_v39 }
 0x5a2   :  { %2578 = vmatmul.mubr.f32.gmra.mxu1 %v1117_v38  ;;  %2591 = vmatmul.mubr.msk.f32.vlgmr.msra.gmra.mxu0 %vm993_vm4, %v3106_v53 }
 0x5a3   :  { %2580 = vmatprep.mubr.f32.mxu1 %v1127_v42  ;;  %2593 = vmatprep.mubr.msk.f32.mxu0 %vm993_vm4, %v3114_v58 }
 0x5a4   :  { %2619 = vmatpush3.msra.mxu0 %v172_v27 }
 0x5a6   :  { %2581 = vmatmul.mubr.f32.gmra.mxu1 %v1137_v48  ;;  %2594 = vmatmul.mubr.msk.f32.gmra.mxu0 %vm993_vm4, %v3130_v6 }
 0x5a7   :  { %2583 = vmatprep.mubr.f32.mxu1 %v1147_v30  ;;  %2596 = vmatprep.mubr.msk.f32.mxu0 %vm993_vm4, %v3134_v11  ;;  %v167_v30 = vld [vmem:[%s3440_s7 + $0x30] sm:$0xff] }
 0x5aa   :  { %2584 = vmatmul.mubr.f32.gmra.mxu1 %v1157_v15  ;;  %2597 = vmatmul.mubr.msk.f32.gmra.mxu0 %vm993_vm4, %v3145_v22 }
 0x5ab   :  { %2599 = vmatprep.mubr.msk.f32.mxu0 %vm993_vm4, %v3064_v25  ;;  %2606 = vmatprep.mubr.msk.f32.mxu1 %vm993_vm4, %v3073_v29  ;;  %v171_v29 = vld [vmem:[%s3440_s7 + $0x50] sm:$0xff] }
 0x5ac   :  { %2620 = vmatprep.subr.mxu0 %v171_v29 }
 0x5ad   :  { %2621 = vmatpush3.msra.mxu0 %v171_v29 }
 0x5ae   :  { %2600 = vmatmul.mubr.msk.f32.gmra.mxu0 %vm993_vm4, %v3102_v52  ;;  %2607 = vmatmul.mubr.msk.f32.vlgmr.msra.gmra.mxu1 %vm993_vm4, %v3106_v53 }
 0x5af   :  { %2609 = vmatprep.mubr.msk.f32.mxu1 %vm993_vm4, %v3114_v58 }
 0x5b2   :  { %2610 = vmatmul.mubr.msk.f32.gmra.mxu1 %vm993_vm4, %v3130_v6 }
 0x5b3   :  { %2612 = vmatprep.mubr.msk.f32.mxu1 %vm993_vm4, %v3134_v11 }
 0x5b6   :  { %2613 = vmatmul.mubr.msk.f32.gmra.mxu1 %vm993_vm4, %v3145_v22 }
 0x5b7   :  { %2615 = vmatprep.mubr.msk.f32.mxu1 %vm993_vm4, %v3064_v25  ;;  %v170_v25 = vld [vmem:[%s3440_s7 + $0x48] sm:$0xff] }
 0x5b8   :  { %2622 = vmatprep.subr.mxu0 %v170_v25 }
 0x5b9   :  { %2623 = vmatpush3.msra.mxu0 %v170_v25 }
 0x5ba   :  { %2616 = vmatmul.mubr.msk.f32.gmra.mxu1 %vm993_vm4, %v3102_v52  ;;  %2624 = vmatprep.subr.mxu0 %v169_v5  ;;  %v164_v52 = vld [vmem:[%s3440_s7 + $0x18] sm:$0xff] }
 0x5bb   :  { %2625 = vmatpush3.msra.mxu0 %v169_v5 }
 0x5bc   :  { %2626 = vmatprep.subr.mxu0 %v168_v9 }
 0x5bd   :  { %2627 = vmatpush3.msra.mxu0 %v168_v9 }
 0x5be   :  { %2628 = vmatprep.subr.mxu0 %v167_v30 }
 0x5bf   :  { %2629 = vmatpush3.msra.mxu0 %v167_v30  ;;  %v161_v30 = vld [vmem:[%s3440_s7] sm:$0xff]  ;;  %s2762_s7 = scalar_lea.vmem %s2181_s2, 256 }
 0x5c0   :  { %2630 = vmatprep.subr.mxu0 %v166_v32  ;;  %p2763_p10 = scmp.ne.s32.totalorder %s2181_s2, %s2762_s7  ;;  %p2768_p12 = scmp.lt.s32.totalorder %s2762_s7, %s2762_s7 }
 0x5c1   :  { %2631 = vmatpush3.msra.mxu0 %v166_v32 }
 0x5c2   :  { %2632 = vmatprep.subr.mxu0 %v165_v34  ;;  %p2769_p13 = por %p2768_p12, %p2767_p11 }
 0x5c3   :  { %2633 = vmatpush3.msra.mxu0 %v165_v34 }
 0x5c4   :  { %2634 = vmatprep.subr.mxu0 %v164_v52  ;;  %p2770_p0 = pnand %p2769_p13, %p2763_p10 }
 0x5c5   :  { %2635 = vmatpush3.msra.mxu0 %v164_v52 }
 0x5c6   :  { %2636 = vmatprep.subr.mxu0 %v163_v59 }
 0x5c7   :  { %2637 = vmatpush3.msra.mxu0 %v163_v59 }
 0x5c8   :  { %2638 = vmatprep.subr.mxu0 %v162_v60 }
 0x5c9   :  { %2639 = vmatpush3.msra.mxu0 %v162_v60 }
 0x5ca   :  { %2640 = vmatprep.subr.mxu0 %v161_v30 }
 0x5cb   :  { %2641 = vmatpush3.msra.mxu0 %v161_v30 }
 0x644   :  { %v2528_v53 = vpop.f32.mrf.mxu0  ;;  %v3303_v58 = vpop.f32.mrf.mxu1 }
 0x646   :  { %v1091_v61 = vpop.f32.mrf.mxu0  ;;  %v3305_v63 = vpop.f32.mrf.mxu1 }
 0x649   :  { %v2531_v62 = vpop.f32.mrf.mxu0 }
 0x64b   :  { %v1111_v1 = vpop.f32.mrf.mxu0 }
 0x64c   :  { %v2544_v2 = vpop.f32.mrf.mxu1 }
 0x64d   :  { %v2534_v3 = vpop.f32.mrf.mxu0  ;;  %v1249_v4 = vadd.f32 %v2544_v2, %v2528_v53 }
 0x64e   :  { %v1242_v6 = vpop.f32.mrf.mxu1 }
 0x64f   :  { %v1131_v7 = vpop.f32.mrf.mxu0  ;;  %v1243_v8 = vadd.f32 %v1242_v6, %v1091_v61 }
 0x651   :  { %v2547_v11 = vpop.f32.mrf.mxu1  ;;  %v2560_v12 = vpop.f32.mrf.mxu0 }
 0x652   :  { %v1261_v15 = vadd.f32 %v2547_v11, %v2531_v62  ;;  %v1368_v16 = vadd.f32 %v2560_v12, %v1249_v4 }
 0x653   :  { %v1254_v17 = vpop.f32.mrf.mxu1  ;;  %v1360_v19 = vpop.f32.mrf.mxu0 }
 0x654   :  { %v1255_v20 = vadd.f32 %v1254_v17, %v1111_v1  ;;  %v1361_v22 = vadd.f32 %v1360_v19, %v1243_v8 }
 0x655   :  { %v2550_v21 = vpop.f32.mrf.mxu1 }
 0x656   :  { %v2563_v23 = vpop.f32.mrf.mxu0  ;;  %v1273_v29 = vadd.f32 %v2550_v21, %v2534_v3 }
 0x657   :  { %v1382_v18 = vadd.f32 %v2563_v23, %v1261_v15  ;;  %v1266_v24 = vpop.f32.mrf.mxu1 }
 0x658   :  { %v1374_v0 = vpop.f32.mrf.mxu0  ;;  %v1267_v53 = vadd.f32 %v1266_v24, %v1131_v7 }
 0x659   :  { %v1375_v26 = vadd.f32 %v1374_v0, %v1255_v20  ;;  %v2553_v28 = vpop.f32.mrf.mxu1 }
 0x65a   :  { %v2566_v31 = vpop.f32.mrf.mxu0  ;;  %v1285_v12 = vadd.f32 %v2553_v28, %v3303_v58  ;;  %v3322_v28 = vld [vmem:[#allocation5 + $0x10] sm:$0xff] }
 0x65b   :  { %v1278_v13 = vpop.f32.mrf.mxu1  ;;  %v1396_v32 = vadd.f32 %v2566_v31, %v1273_v29 }
 0x65c   :  { %v1388_v14 = vpop.f32.mrf.mxu0  ;;  %v1279_v3 = vadd.f32 %v1278_v13, %v3305_v63  ;;  %v3326_v13 = vld [vmem:[#allocation5 + $0x18] sm:$0xff] }
 0x65d   :  { %v2576_v33 = vpop.f32.mrf.mxu1  ;;  %v1389_v4 = vadd.f32 %v1388_v14, %v1267_v53  ;;  %v1799_v14 = vpop.permute.xlu1 %1798 }
 0x65e   :  { %v2569_v35 = vpop.f32.mrf.mxu0  ;;  %v1493_v36 = vadd.f32 %v2576_v33, %v1368_v16 }
 0x65f   :  { %v1484_v37 = vpop.f32.mrf.mxu1 }
 0x660   :  { %v1402_v10 = vpop.f32.mrf.mxu0  ;;  %v1485_v38 = vadd.f32 %v1484_v37, %v1361_v22  ;;  %v1410_v22 = vadd.f32 %v2569_v35, %v1285_v12 }
 0x661   :  { %v1403_v15 = vadd.f32 %v1402_v10, %v1279_v3  ;;  %v1801_v33 = vpop.permute.xlu1 %1800 }
 0x662   :  { %v2579_v39 = vpop.f32.mrf.mxu1  ;;  %v2592_v40 = vpop.f32.mrf.mxu0 }
 0x663   :  { %v1509_v41 = vadd.f32 %v2579_v39, %v1382_v18  ;;  %v1624_v42 = vadd.f32 %v2592_v40, %v1493_v36 }
 0x664   :  { %v1500_v43 = vpop.f32.mrf.mxu1  ;;  %v1617_v44 = vpop.f32.mrf.mxu0 }
 0x665   :  { %v1501_v45 = vadd.f32 %v1500_v43, %v1375_v26  ;;  %v1618_v46 = vadd.f32 %v1617_v44, %v1485_v38 }
 0x666   :  { %v2582_v47 = vpop.f32.mrf.mxu1  ;;  %v2595_v48 = vpop.f32.mrf.mxu0 }
 0x667   :  { %v1636_v49 = vadd.f32 %v2595_v48, %v1509_v41  ;;  %v1525_v61 = vadd.f32 %v2582_v47, %v1396_v32  ;;  %v2260_v48 = vld [vmem:[%s3442_s9] ss:$0 sm:$0xff] }
 0x668   :  { %v1516_v50 = vpop.f32.mrf.mxu1  ;;  %v1629_v51 = vpop.f32.mrf.mxu0 }
 0x669   :  { %v1630_v54 = vadd.f32 %v1629_v51, %v1501_v45  ;;  %v1517_v16 = vadd.f32 %v1516_v50, %v1389_v4 }
 0x66a   :  { %v2585_v55 = vpop.f32.mrf.mxu1  ;;  %v2598_v56 = vpop.f32.mrf.mxu0 }
 0x66b   :  { %v1648_v6 = vadd.f32 %v2598_v56, %v1525_v61  ;;  %v1541_v18 = vadd.f32 %v2585_v55, %v1410_v22  ;;  %v178_v22 = vld [vmem:[%s3441_s8 + $0x28] sm:$0xff] }
 0x66c   :  { %v1532_v57 = vpop.f32.mrf.mxu1  ;;  %v1641_v5 = vpop.f32.mrf.mxu0 }
 0x66d   :  { %v1533_v7 = vadd.f32 %v1532_v57, %v1403_v15  ;;  %v1642_v21 = vadd.f32 %v1641_v5, %v1517_v16 }
 0x66e   :  { %v2608_v27 = vpop.f32.mrf.mxu1  ;;  %v2601_v1 = vpop.f32.mrf.mxu0 }
 0x66f   :  { %v1739_v25 = vadd.f32 %v2608_v27, %v1624_v42  ;;  %v1660_v26 = vadd.f32 %v2601_v1, %v1541_v18  ;;  %v174_v18 = vld [vmem:[%s3441_s8 + $0x8] sm:$0xff] }
 0x670   :  { %v1732_v9 = vpop.f32.mrf.mxu1  ;;  %v1653_v19 = vpop.f32.mrf.mxu0 }
 0x671   :  { %v1733_v34 = vadd.f32 %v1732_v9, %v1618_v46  ;;  %v1654_v24 = vadd.f32 %v1653_v19, %v1533_v7  ;;  %v180_v19 = vld [vmem:[%s3441_s8 + $0x38] sm:$0xff]  ;;  %v177_v7 = vld [vmem:[%s3441_s8 + $0x20] sm:$0xff] }
 0x672   :  { %v2611_v52 = vpop.f32.mrf.mxu1  ;;  %2648 = vmatprep.subr.mxu1 %v180_v19 }
 0x673   :  { %v1751_v62 = vadd.f32 %v2611_v52, %v1636_v49  ;;  %2649 = vmatpush3.msra.mxu1 %v180_v19 }
 0x674   :  { %v1744_v2 = vpop.f32.mrf.mxu1 }
 0x675   :  { %v1745_v8 = vadd.f32 %v1744_v2, %v1630_v54 }
 0x676   :  { %v2614_v11 = vpop.f32.mrf.mxu1 }
 0x677   :  { %v1763_v17 = vadd.f32 %v2614_v11, %v1648_v6 }
 0x678   :  { %v1756_v20 = vpop.f32.mrf.mxu1 }
 0x679   :  { %1784 = vrot.lane.b32.xlu1 %v1763_v17, %s2815_s27  ;;  %v1757_v63 = vadd.f32 %v1756_v20, %v1642_v21  ;;  %v179_v20 = vld [vmem:[%s3441_s8 + $0x30] sm:$0xff]  ;;  %v176_v21 = vld [vmem:[%s3441_s8 + $0x18] sm:$0xff] }
 0x67a   :  { %v2617_v23 = vpop.f32.mrf.mxu1  ;;  %2650 = vmatprep.subr.mxu1 %v179_v20 }
 0x67b   :  { %v1775_v58 = vadd.f32 %v2617_v23, %v1660_v26  ;;  %2651 = vmatpush3.msra.mxu1 %v179_v20  ;;  %v175_v23 = vld [vmem:[%s3441_s8 + $0x10] sm:$0xff] }
 0x67c   :  { %v1768_v0 = vpop.f32.mrf.mxu1  ;;  %2652 = vmatprep.subr.mxu1 %v178_v22 }
 0x67d   :  { %v1769_v31 = vadd.f32 %v1768_v0, %v1654_v24  ;;  %1782 = vrot.lane.b32.xlu1 %v1757_v63, %s2815_s27  ;;  %2653 = vmatpush3.msra.mxu1 %v178_v22  ;;  %v173_v24 = vld [vmem:[%s3441_s8] sm:$0xff] }
 0x67e   :  { %2654 = vmatprep.subr.mxu1 %v177_v7 }
 0x67f   :  { %1786 = vrot.lane.b32.xlu0 %v1769_v31, %s2815_s27  ;;  %2655 = vmatpush3.msra.mxu1 %v177_v7 }
 0x680   :  { %2656 = vmatprep.subr.mxu1 %v176_v21 }
 0x681   :  { %1788 = vrot.lane.b32.xlu1 %v1775_v58, %s2815_s27  ;;  %2657 = vmatpush3.msra.mxu1 %v176_v21 }
 0x682   :  { %2658 = vmatprep.subr.mxu1 %v175_v23 }
 0x683   :  { %1802 = vrot.lane.b32.xlu0 %v3322_v28, %s2817_s6  ;;  %2659 = vmatpush3.msra.mxu1 %v175_v23 }
 0x684   :  { %2660 = vmatprep.subr.mxu1 %v174_v18 }
 0x685   :  { %1804 = vrot.lane.b32.xlu1 %v3326_v13, %s2817_s6  ;;  %2661 = vmatpush3.msra.mxu1 %v174_v18 }
 0x686   :  { %2662 = vmatprep.subr.mxu1 %v173_v24 }
 0x687   :  { %2663 = vmatpush3.msra.mxu1 %v173_v24 }
 0x6eb   :  { %v1785_v35 = vpop.permute.xlu1 %1784 }
 0x6ec   :  { %v1811_v36 = vsel %vm193_vm0, %v1739_v25, %v1785_v35 }
 0x6ed   :  { %v1815_v40 = vsel %vm742_vm3, %v1811_v36, %v1801_v33 }
 0x6ef   :  { %v1783_v37 = vpop.permute.xlu1 %1782 }
 0x6f0   :  { %v1810_v10 = vsel %vm193_vm0, %v1733_v34, %v1783_v37 }
 0x6f1   :  { %v1787_v38 = vpop.permute.xlu0 %1786  ;;  %v1814_v39 = vsel %vm742_vm3, %v1810_v10, %v1799_v14 }
 0x6f2   :  { %2642 = vmatprep.mubr.msk.f32.mxu0 %vm1822_vm13, %v1814_v39  ;;  %v1812_v42 = vsel %vm193_vm0, %v1745_v8, %v1787_v38 }
 0x6f3   :  { %2643 = vmatmul.mubr.msk.f32.vlgmr.msra.gmra.mxu0 %vm1822_vm13, %v1815_v40  ;;  %v1789_v41 = vpop.permute.xlu1 %1788  ;;  %v2265_v40 = vld [vmem:[%s3442_s9 + $0x1] ss:$0 sm:$0xff] }
 0x6f4   :  { %v1813_v45 = vsel %vm193_vm0, %v1751_v62, %v1789_v41 }
 0x6f5   :  { %v1803_v43 = vpop.permute.xlu0 %1802 }
 0x6f6   :  { %v1816_v44 = vsel %vm742_vm3, %v1812_v42, %v1803_v43  ;;  %v2266_v43 = vld [vmem:[%s3442_s9 + $0x2] ss:$0 sm:$0xff] }
 0x6f7   :  { %2645 = vmatprep.mubr.msk.f32.mxu0 %vm1822_vm13, %v1816_v44  ;;  %v1805_v46 = vpop.permute.xlu1 %1804 }
 0x6f8   :  { %v1817_v47 = vsel %vm742_vm3, %v1813_v45, %v1805_v46 }
 0x6f9   :  { %2646 = vmatmul.mubr.msk.f32.gmra.mxu0 %vm1822_vm13, %v1817_v47 }
 0x7b3   :  { %v2644_v49 = vpop.f32.mrf.mxu0 }
 0x7b4   :  { %v1907_v50 = vadd.f32 %v2644_v49, %v2260_v48 }
 0x7b5   :  { %v1901_v51 = vpop.f32.mrf.mxu0 }
 0x7b6   :  { %v1902_v54 = vadd.f32 %v2260_v48, %v1901_v51  ;;  %v1923_v55 = vsel %vm742_vm3, %v1907_v50, 0.0 }
 0x7b7   :  { %1924 = vadd.xlane.f32.xlu1 %v1923_v55 }
 0x7b8   :  { %v1920_v56 = vsel %vm742_vm3, %v1902_v54, 0.0 }
 0x7b9   :  { %1921 = vadd.xlane.f32.xlu0 %v1920_v56  ;;  %v2647_v57 = vpop.f32.mrf.mxu0 }
 0x7ba   :  { %v1917_v27 = vadd.f32 %v2647_v57, %v2260_v48 }
 0x7bb   :  { %v1911_v59 = vpop.f32.mrf.mxu0 }
 0x7bc   :  { %v1912_v60 = vadd.f32 %v2260_v48, %v1911_v59  ;;  %v1929_v25 = vsel %vm742_vm3, %v1917_v27, 0.0 }
 0x7be   :  { %v1926_v29 = vsel %vm742_vm3, %v1912_v60, 0.0 }
 0x7bf   :  { %1927 = vadd.xlane.f32.xlu0 %v1926_v29 }
 0x7c3   :  { %1930 = vadd.xlane.f32.xlu0 %v1929_v25 }
 0x840   :  { %v1925_v5 = vpop.xlane.xlu1 %1924 }
 0x841   :  { %v1933_v9 = vmul.f32 0.015625, %v1925_v5  ;;  %v2267_v5 = vld [vmem:[%s3442_s9 + $0x3] ss:$0 sm:$0xff] }
 0x842   :  { %v1922_v30 = vpop.xlane.xlu0 %1921 }
 0x843   :  { %v3345_v32 = vsub.f32 %v1907_v50, %v1933_v9  ;;  %v1932_v34 = vmul.f32 0.015625, %v1922_v30 }
 0x845   :  { %v3347_v52 = vsub.f32 %v1902_v54, %v1932_v34  ;;  %v1941_v53 = vmul.f32 %v3345_v32, %v3345_v32 }
 0x847   :  { %v1947_v61 = vsel %vm742_vm3, %v1941_v53, 0.0  ;;  %v1940_v62 = vmul.f32 %v3347_v52, %v3347_v52 }
 0x848   :  { %v1928_v1 = vpop.xlane.xlu0 %1927  ;;  %1948 = vadd.xlane.f32.xlu0 %v1947_v61 }
 0x849   :  { %v1934_v2 = vmul.f32 0.015625, %v1928_v1  ;;  %v1944_v3 = vsel %vm742_vm3, %v1940_v62, 0.0 }
 0x84a   :  { %1945 = vadd.xlane.f32.xlu1 %v1944_v3 }
 0x84b   :  { %v1938_v4 = vsub.f32 %v1912_v60, %v1934_v2 }
 0x84c   :  { %v1931_v6 = vpop.xlane.xlu0 %1930 }
 0x84d   :  { %v1935_v8 = vmul.f32 0.015625, %v1931_v6  ;;  %v1942_v11 = vmul.f32 %v1938_v4, %v1938_v4 }
 0x84f   :  { %v3355_v12 = vsub.f32 %v1917_v27, %v1935_v8  ;;  %v1950_v15 = vsel %vm742_vm3, %v1942_v11, 0.0 }
 0x850   :  { %1951 = vadd.xlane.f32.xlu1 %v1950_v15 }
 0x851   :  { %v1943_v16 = vmul.f32 %v3355_v12, %v3355_v12 }
 0x853   :  { %v1953_v17 = vsel %vm742_vm3, %v1943_v16, 0.0 }
 0x854   :  { %1954 = vadd.xlane.f32.xlu0 %v1953_v17 }
 0x8d1   :  { %v1949_v63 = vpop.xlane.xlu0 %1948 }
 0x8d2   :  { %v1957_v0 = vmul.f32 0.015625, %v1949_v63 }
 0x8d3   :  { %v1946_v26 = vpop.xlane.xlu1 %1945 }
 0x8d4   :  { %v1961_v31 = vadd.f32 1e-05, %v1957_v0  ;;  %v1956_v58 = vmul.f32 0.015625, %v1946_v26 }
 0x8d6   :  { %2694 = vrsqrt.f32 %v1961_v31  ;;  %v1960_v14 = vadd.f32 1e-05, %v1956_v58 }
 0x8d8   :  { %2696 = vrsqrt.f32 %v1960_v14 }
 0x8d9   :  { %v1952_v33 = vpop.xlane.xlu1 %1951 }
 0x8da   :  { %v1958_v35 = vmul.f32 0.015625, %v1952_v33 }
 0x8dc   :  { %v1962_v36 = vadd.f32 1e-05, %v1958_v35 }
 0x8dd   :  { %v1955_v37 = vpop.xlane.xlu0 %1954 }
 0x8de   :  { %2698 = vrsqrt.f32 %v1962_v36  ;;  %v1959_v10 = vmul.f32 0.015625, %v1955_v37 }
 0x8e0   :  { %v1963_v38 = vadd.f32 1e-05, %v1959_v10 }
 0x8e2   :  { %2700 = vrsqrt.f32 %v1963_v38 }
 0x8e3   :  { %v2695_v39 = vpop.eup %2694 }
 0x8e4   :  { %v1969_v41 = vmul.f32 %v2695_v39, %v3345_v32 }
 0x8e5   :  { %v2697_v42 = vpop.eup %2696 }
 0x8e6   :  { %v1968_v44 = vmul.f32 %v2697_v42, %v3347_v52  ;;  %v1977_v45 = vmul.f32 %v2265_v40, %v1969_v41 }
 0x8e8   :  { %v1976_v46 = vmul.f32 %v2265_v40, %v1968_v44  ;;  %v1985_v47 = vadd.f32 %v2266_v43, %v1977_v45 }
 0x8ea   :  { %v1984_v48 = vadd.f32 %v2266_v43, %v1976_v46  ;;  %v1989_v54 = vmax.f32 %v1985_v47, 0.0 }
 0x8eb   :  { %v2699_v49 = vpop.eup %2698 }
 0x8ec   :  { %v1988_v50 = vmax.f32 %v1984_v48, 0.0  ;;  %v1970_v51 = vmul.f32 %v2699_v49, %v1938_v4 }
 0x8ee   :  { %2664 = vmatprep.mubr.msk.f32.mxu1 %vm742_vm3, %v1988_v50  ;;  %v1978_v55 = vmul.f32 %v2265_v40, %v1970_v51 }
 0x8ef   :  { %v2701_v56 = vpop.eup %2700  ;;  %2665 = vmatmul.mubr.msk.f32.vlgmr.msra.gmra.mxu1 %vm742_vm3, %v1989_v54 }
 0x8f0   :  { %v1986_v57 = vadd.f32 %v2266_v43, %v1978_v55  ;;  %v1971_v59 = vmul.f32 %v2701_v56, %v3355_v12 }
 0x8f2   :  { %v1990_v60 = vmax.f32 %v1986_v57, 0.0  ;;  %v1979_v27 = vmul.f32 %v2265_v40, %v1971_v59 }
 0x8f4   :  { %2667 = vmatprep.mubr.msk.f32.mxu1 %vm742_vm3, %v1990_v60  ;;  %v1987_v29 = vadd.f32 %v2266_v43, %v1979_v27 }
 0x8f6   :  { %v1991_v25 = vmax.f32 %v1987_v29, 0.0 }
 0x8f8   :  { %2668 = vmatmul.mubr.msk.f32.gmra.mxu1 %vm742_vm3, %v1991_v25 }
 0x9af   :  { %v2666_v9 = vpop.f32.mrf.mxu1 }
 0x9b0   :  { %v2080_v30 = vadd.f32 %v2666_v9, %v2267_v5 }
 0x9b1   :  { %v2074_v32 = vpop.f32.mrf.mxu1 }
 0x9b2   :  { %v2075_v34 = vadd.f32 %v2267_v5, %v2074_v32  ;;  %v2096_v52 = vsel %vm193_vm0, %v2080_v30, 0.0 }
 0x9b3   :  { %2097 = vadd.xlane.f32.xlu0 %v2096_v52 }
 0x9b4   :  { %v2093_v53 = vsel %vm193_vm0, %v2075_v34, 0.0 }
 0x9b5   :  { %2094 = vadd.xlane.f32.xlu1 %v2093_v53 }
 0x9b8   :  { %v2669_v61 = vpop.f32.mrf.mxu1 }
 0x9b9   :  { %v2090_v62 = vadd.f32 %v2669_v61, %v2267_v5 }
 0x9ba   :  { %v2084_v1 = vpop.f32.mrf.mxu1 }
 0x9bb   :  { %v2085_v2 = vadd.f32 %v2267_v5, %v2084_v1  ;;  %v2102_v3 = vsel %vm193_vm0, %v2090_v62, 0.0 }
 0x9bc   :  { %2103 = vadd.xlane.f32.xlu0 %v2102_v3 }
 0x9bd   :  { %v2099_v4 = vsel %vm193_vm0, %v2085_v2, 0.0 }
 0x9be   :  { %2100 = vadd.xlane.f32.xlu1 %v2099_v4 }
 0xa3c   :  { %v2098_v6 = vpop.xlane.xlu0 %2097 }
 0xa3d   :  { %v2106_v8 = vmul.f32 0.03125, %v2098_v6 }
 0xa3e   :  { %v2095_v11 = vpop.xlane.xlu1 %2094 }
 0xa3f   :  { %v2110_v12 = vsub.f32 %v2080_v30, %v2106_v8  ;;  %v2105_v15 = vmul.f32 0.03125, %v2095_v11 }
 0xa41   :  { %v2109_v16 = vsub.f32 %v2075_v34, %v2105_v15  ;;  %v2114_v17 = vmul.f32 %v2110_v12, %v2110_v12 }
 0xa43   :  { %v2120_v19 = vsel %vm193_vm0, %v2114_v17, 0.0  ;;  %v2113_v20 = vmul.f32 %v2109_v16, %v2109_v16 }
 0xa44   :  { %2121 = vadd.xlane.f32.xlu0 %v2120_v19 }
 0xa45   :  { %v2104_v22 = vpop.xlane.xlu0 %2103  ;;  %v2117_v7 = vsel %vm193_vm0, %v2113_v20, 0.0 }
 0xa46   :  { %v2108_v21 = vmul.f32 0.03125, %v2104_v22  ;;  %2118 = vadd.xlane.f32.xlu1 %v2117_v7 }
 0xa47   :  { %v2101_v23 = vpop.xlane.xlu1 %2100 }
 0xa48   :  { %v2112_v18 = vsub.f32 %v2090_v62, %v2108_v21  ;;  %v2107_v24 = vmul.f32 0.03125, %v2101_v23 }
 0xa4a   :  { %v2111_v63 = vsub.f32 %v2085_v2, %v2107_v24  ;;  %v2116_v0 = vmul.f32 %v2112_v18, %v2112_v18 }
 0xa4c   :  { %v2126_v26 = vsel %vm193_vm0, %v2116_v0, 0.0  ;;  %v2115_v31 = vmul.f32 %v2111_v63, %v2111_v63 }
 0xa4d   :  { %2127 = vadd.xlane.f32.xlu0 %v2126_v26 }
 0xa4e   :  { %v2123_v58 = vsel %vm193_vm0, %v2115_v31, 0.0 }
 0xa4f   :  { %2124 = vadd.xlane.f32.xlu1 %v2123_v58 }
 0xa50   :  { %2773 = shalt.err (!%p2770_p0)
}
 0xa51   :  { %2186 = dma.vmem_to_hbm [thread:$0]  %s2181_s2, 256, %s3443_s10, [#allocation4], %s2811_s20, %s2811_s20, %s2812_s21   ;;  %v2720_v30 = vld [vmem:[#allocation5 + $0x8] sm:$0xff]  ;;  %v2721_v52 = vld [vmem:[#allocation5] sm:$0xff] }
 0xa52   :  { %v2272_v45 = vld [vmem:[%s3442_s9 + $0x4] ss:$0 sm:$0xff]  ;;  %v2273_v48 = vld [vmem:[%s3442_s9 + $0x5] ss:$0 sm:$0xff]  ;;  %s2819_s9 = smov [#allocation8]  }
 0xa53   :  { %s2192_s30 = sshll.u32 %s2819_s9, 4  ;;  %s2193_s30 = int_to_ptr.vmem [resolvable:$true] %s2192_s30 }
 0xa54   :  { %s2782_s12 = scalar_lea.vmem %s2193_s30, 512  ;;  %p2787_p2 = scmp.lt.s32.totalorder %s2193_s30, %s2193_s30 }
 0xa55   :  { %p2783_p1 = scmp.ne.s32.totalorder %s2193_s30, %s2782_s12  ;;  %p2788_p3 = scmp.lt.s32.totalorder %s2782_s12, %s2782_s12 }
 0xa57   :  { %p2789_p4 = por %p2788_p3, %p2787_p2 }
 0xa59   :  { %p2790_p5 = pnand %p2789_p4, %p2783_p1 }
 0xacd   :  { %v2122_v14 = vpop.xlane.xlu0 %2121 }
 0xace   :  { %v2130_v33 = vmul.f32 0.03125, %v2122_v14 }
 0xacf   :  { %v2119_v35 = vpop.xlane.xlu1 %2118 }
 0xad0   :  { %v2134_v36 = vadd.f32 1e-05, %v2130_v33  ;;  %v2129_v37 = vmul.f32 0.03125, %v2119_v35 }
 0xad2   :  { %2702 = vrsqrt.f32 %v2134_v36  ;;  %v2133_v10 = vadd.f32 1e-05, %v2129_v37 }
 0xad4   :  { %2704 = vrsqrt.f32 %v2133_v10 }
 0xad6   :  { %v2128_v38 = vpop.xlane.xlu0 %2127 }
 0xad7   :  { %v2132_v39 = vmul.f32 0.03125, %v2128_v38 }
 0xad8   :  { %v2125_v40 = vpop.xlane.xlu1 %2124 }
 0xad9   :  { %v2136_v41 = vadd.f32 1e-05, %v2132_v39  ;;  %v2131_v42 = vmul.f32 0.03125, %v2125_v40 }
 0xadb   :  { %2706 = vrsqrt.f32 %v2136_v41  ;;  %v2135_v43 = vadd.f32 1e-05, %v2131_v42 }
 0xadd   :  { %2708 = vrsqrt.f32 %v2135_v43 }
 0xadf   :  { %v2703_v44 = vpop.eup %2702 }
 0xae0   :  { %v2142_v46 = vmul.f32 %v2703_v44, %v2110_v12 }
 0xae1   :  { %v2705_v47 = vpop.eup %2704 }
 0xae2   :  { %v2150_v49 = vmul.f32 %v2272_v45, %v2142_v46  ;;  %v2141_v50 = vmul.f32 %v2705_v47, %v2109_v16 }
 0xae4   :  { %v2158_v51 = vadd.f32 %v2273_v48, %v2150_v49  ;;  %v2149_v54 = vmul.f32 %v2272_v45, %v2141_v50 }
 0xae6   :  { %2710 = vtanh.f32 %v2158_v51  ;;  %v2157_v55 = vadd.f32 %v2273_v48, %v2149_v54 }
 0xae8   :  { %v2707_v56 = vpop.eup %2706  ;;  %2712 = vtanh.f32 %v2157_v55 }
 0xae9   :  { %v2144_v57 = vmul.f32 %v2707_v56, %v2112_v18 }
 0xaea   :  { %v2709_v59 = vpop.eup %2708 }
 0xaeb   :  { %v2152_v60 = vmul.f32 %v2272_v45, %v2144_v57  ;;  %v2143_v27 = vmul.f32 %v2709_v59, %v2111_v63 }
 0xaed   :  { %v2160_v29 = vadd.f32 %v2273_v48, %v2152_v60  ;;  %v2151_v25 = vmul.f32 %v2272_v45, %v2143_v27 }
 0xaef   :  { %2714 = vtanh.f32 %v2160_v29  ;;  %v2159_v5 = vadd.f32 %v2273_v48, %v2151_v25 }
 0xaf1   :  { %2716 = vtanh.f32 %v2159_v5 }
 0xaf3   :  { %v2711_v9 = vpop.eup %2710 }
 0xaf4   :  { %v2166_v32 = vadd.f32 %v2720_v30, %v2711_v9 }
 0xaf5   :  { %v2713_v34 = vpop.eup %2712 }
 0xaf6   :  { %v2165_v53 = vadd.f32 %v2721_v52, %v2713_v34  ;;  %2172 = vst.msk [vmem:[#allocation8 + $0x8] sm:$0xff] %vm193_vm0, %v2166_v32 }
 0xaf8   :  { %2171 = vst.msk [vmem:[#allocation8] sm:$0xff] %vm193_vm0, %v2165_v53 }
 0xafc   :  { %v2715_v61 = vpop.eup %2714 }
 0xafd   :  { %v2168_v62 = vadd.f32 %v3326_v13, %v2715_v61 }
 0xafe   :  { %v2717_v1 = vpop.eup %2716 }
 0xaff   :  { %v2167_v2 = vadd.f32 %v3322_v28, %v2717_v1  ;;  %2174 = vst.msk [vmem:[#allocation8 + $0x18] sm:$0xff] %vm193_vm0, %v2168_v62 }
 0xb01   :  { %2173 = vst.msk [vmem:[#allocation8 + $0x10] sm:$0xff] %vm193_vm0, %v2167_v2 }
 0xb02   :  { %2793 = shalt.err (!%p2790_p5)
}
 0xb03   :  { %2198 = dma.vmem_to_hbm [thread:$0]  %s2193_s30, 512, %s3444_s11, [#allocation9], %s2811_s20, %s2811_s20, %s2812_s21  }
 0xb04   :  { %2806 = dma.done.wait [#allocation4], 256  }
 0xb05   :  { %2807 = vsyncadd [#allocation4], 4294967040 }
 0xb06   :  { %2808 = dma.done.wait [#allocation9], 512  }
 0xb07   :  { %2809 = vsyncadd [#allocation9], 4294966784 }
 0xb08   :  { %2205 = vsyncpa [#allocation3], 1 }
 0xb09   :  { %2206 = vsyncpa [#allocation6], 1 }
 0xb0a   :  { %2207 = vsyncpa [#allocation4], 1 }
 0xb0b   :  { %2208 = vsyncpa [#allocation9], 1 }

</bundles_post_ra>
